<compile_context>
chip_gen: v5e
topology: v5e:2x2
jax: 0.10.0
libtpu: 0.0.40
codegen_flags: <defaults>
</compile_context>

<pallas_src>
import functools

import jax
import jax.numpy as jnp
from jax.experimental import pallas as pl
from jax.experimental.pallas import tpu as pltpu

EPS = 1e-5


def _gelu(x):
    # TODO(synk): the reference `Activation` class is not provided; this is the
    # tanh-approx GELU (power=1.0). Exact-erf GELU would differ at ~1e-3 level.
    c = 0.7978845608028654  # sqrt(2/pi)
    return 0.5 * x * (1.0 + jnp.tanh(c * (x + 0.044715 * x * x * x)))


def _layernorm(x, gamma, beta):
    mean = jnp.mean(x, axis=-1, keepdims=True)
    cent = x - mean
    var = jnp.mean(cent * cent, axis=-1, keepdims=True)
    inv = jax.lax.rsqrt(var + EPS)
    return cent * inv * gamma + beta


def _bdot(a, w_bf16):
    """bf16 x bf16 MXU matmul with f32 accumulation (cast only at the boundary)."""
    return jnp.dot(a.astype(jnp.bfloat16), w_bf16,
                   preferred_element_type=jnp.float32)


def _mlp_kernel(
    x_ref,
    g0_ref, be0_ref,                 # exterior LayerNorm 0 (f32)
    w0_ref, b0_ref, w1_ref, b1_ref,  # MLP0: LinearAct, LinearAct (w bf16, b f32)
    w2_ref, b2_ref,                  # MLP0: output Conv1D
    g1_ref, be1_ref,                 # exterior LayerNorm 1 (f32)
    w3_ref, b3_ref,                  # MLP1: GeGLU fc  (E, 2E)
    w4_ref, b4_ref,                  # MLP1: output Conv1D
    o_ref,
):
    x = x_ref[...]                                          # (TM, E) f32
    E = x.shape[-1]

    # ---- residual block 0 : base MLP -------------------------------------
    ln0 = _layernorm(x, g0_ref[...], be0_ref[...])
    # Activations live in bf16 between matmuls; bias-add + gelu math in f32.
    h = _gelu(_bdot(ln0, w0_ref[...]) + b0_ref[...]).astype(jnp.bfloat16)
    h = _gelu(_bdot(h, w1_ref[...]) + b1_ref[...]).astype(jnp.bfloat16)
    r1 = x + _bdot(h, w2_ref[...]) + b2_ref[...]            # (TM, E) f32 residual

    # ---- residual block 1 : GeGLU MLP ------------------------------------
    ln1 = _layernorm(r1, g1_ref[...], be1_ref[...])
    y = _bdot(ln1, w3_ref[...]) + b3_ref[...]               # (TM, 2E), one MXU push
    # torch `.chunk(2, dim=-1)`: first half = hidden_states, second half = gate;
    # output = act(gate) * hidden_states (verified against the PyTorch source).
    hid = y[:, :E]
    gate = y[:, E:]
    g = (_gelu(gate) * hid).astype(jnp.bfloat16)
    o_ref[...] = r1 + _bdot(g, w4_ref[...]) + b4_ref[...]


# ----------------------------------------------------------------------------
# Host-side helpers
# ----------------------------------------------------------------------------

def _round_up(n, m):
    return ((n + m - 1) // m) * m


@functools.lru_cache(maxsize=None)
def _supports_single_buffer():
    """True if this jax build accepts pipeline_mode=pl.Buffered(1) on BlockSpec."""
    try:
        pl.BlockSpec((8, 128), lambda i: (0, 0), pipeline_mode=pl.Buffered(1))
        return True
    except (TypeError, AttributeError):
        return False


def _const_index_map(ndim):
    return lambda *_: (0,) * ndim


def _invariant_spec(arr, single_buffer):
    """Full-array BlockSpec for a grid-invariant operand (weights / biases)."""
    idx = _const_index_map(arr.ndim)
    if single_buffer:
        # Constant index_map => fetched once; a second buffer is pure VMEM waste.
        return pl.BlockSpec(arr.shape, idx, pipeline_mode=pl.Buffered(1))
    return pl.BlockSpec(arr.shape, idx)


def _default_tm():
    """Per-generation row tile: 128 on v5e (4x128 MXU), 256 on v6e / v7x."""
    try:
        kind = jax.devices()[0].device_kind.lower()
    except Exception:
        return 256
    if "v5e" in kind or "v5 lite" in kind or "v5lite" in kind:
        return 128
    return 256  # v6e has headroom to sweep 384-512 once weights are single-buffered


def _vmem_cap_bytes():
    """Physical VMEM per TensorCore minus headroom (v7x: 64 MiB; v5e/v6e: 128)."""
    try:
        return int(pltpu.get_tpu_info().vmem_capacity_bytes) - (8 << 20)
    except Exception:
        return 56 << 20  # conservative fallback: fits every generation


def _vmem_budget_bytes(E, tm, weight_buffers):
    w = weight_buffers * 2 * (11 * E * E)        # bf16 weights (w0,w1,w2,w3,w4)
    small = weight_buffers * 4 * 24 * E          # f32 biases + LN params (rough)
    io = 2 * 2 * tm * E * 4                      # x / out tiles, double-buffered
    interm = 6 * tm * 2 * E * 4                  # live f32/bf16 intermediates
    return w + small + io + interm + (4 << 20)   # + compiler scratch headroom


# ----------------------------------------------------------------------------
# Public wrapper
# ----------------------------------------------------------------------------

def gpt2_mlp_multiple_residual(x, params, *, tm=None, single_buffer_weights=True):
    """x: (B, T, E) float32.  params: dict of weights (see make_params).

    tm=None picks a per-generation row tile (128 on v5e, 256 on v6e/v7x).
    E % 128 == 0 is strongly recommended for performance (hid/gate split lands
    on a lane-tile boundary); other E still run since blocks cover the full E.
    """
    B, T, E = x.shape
    N = B * T
    if tm is None:
        tm = _default_tm()

    # Effective row tile: never larger than the (sublane-rounded) token count.
    tm_eff = min(tm, _round_up(N, 8))
    n_pad = _round_up(N, tm_eff)
    # Megacore-friendly: give the 1-D "parallel" grid >= 2 steps when possible
    # so both v7x TensorCores get work (each core holds its own weight copy).
    if n_pad // tm_eff < 2 and N > 8:
        tm_eff = _round_up(-(-N // 2), 8)
        n_pad = _round_up(N, tm_eff)
    n_steps = n_pad // tm_eff

    single = bool(single_buffer_weights) and _supports_single_buffer()
    weight_buffers = 1 if single else 2

    cap = _vmem_cap_bytes()
    budget = _vmem_budget_bytes(E, tm_eff, weight_buffers)
    if budget > cap:
        raise NotImplementedError(
            f"embed_dim={E}: resident weights need ~{budget >> 20} MiB VMEM but "
            f"the per-core cap is ~{cap >> 20} MiB. TODO(synk): stream K/N "
            "weight tiles over an 'arbitrary' grid axis with a VMEM f32 "
            "accumulator for large embed_dim.")
    vmem_limit = min(max(budget, 16 << 20), cap)

    x2 = x.reshape(N, E).astype(jnp.float32)
    if n_pad != N:
        # Padding rows is safe: LayerNorm / GELU are per-row and padded rows
        # are sliced off the output.
        x2 = jnp.pad(x2, ((0, n_pad - N), (0, 0)))

    weights = [
        params["ln0_g"], params["ln0_b"],
        params["w0"], params["b0"], params["w1"], params["b1"],
        params["w2"], params["b2"],
        params["ln1_g"], params["ln1_b"],
        params["w3"], params["b3"],
        params["w4"], params["b4"],
    ]

    cost = pl.CostEstimate(
        flops=2 * 11 * E * E * n_pad,            # 5 matmuls: 11*E^2 MACs / token
        transcendentals=5 * E * n_pad,           # tanh in the three GELUs
        bytes_accessed=2 * 11 * E * E + 24 * E * 4 + 2 * n_pad * E * 4,
    )

    out = pl.pallas_call(
        _mlp_kernel,
        out_shape=jax.ShapeDtypeStruct((n_pad, E), jnp.float32),
        grid_spec=pltpu.PrefetchScalarGridSpec(
            num_scalar_prefetch=0,
            grid=(n_steps,),
            in_specs=[pl.BlockSpec((tm_eff, E), lambda i: (i, 0))]
                     + [_invariant_spec(w, single) for w in weights],
            out_specs=pl.BlockSpec((tm_eff, E), lambda i: (i, 0)),
        ),
        compiler_params=pltpu.CompilerParams(
            dimension_semantics=("parallel",),
            vmem_limit_bytes=vmem_limit,
        ),
        cost_estimate=cost,
    )(x2, *weights)

    return out[:N].reshape(B, T, E)


# ----------------------------------------------------------------------------
# Reference + parameter construction + demo
# ----------------------------------------------------------------------------

def _reference(x, p):
    """Pure-JAX reference mirroring the kernel numerics (bf16 MXU operands)."""
    B, T, E = x.shape
    h = x.reshape(-1, E).astype(jnp.float32)
    ln0 = _layernorm(h, p["ln0_g"], p["ln0_b"])
    a = _gelu(_bdot(ln0, p["w0"]) + p["b0"])
    a = _gelu(_bdot(a, p["w1"]) + p["b1"])
    r1 = h + _bdot(a, p["w2"]) + p["b2"]
    ln1 = _layernorm(r1, p["ln1_g"], p["ln1_b"])
    y = _bdot(ln1, p["w3"]) + p["b3"]
    hid, gate = y[:, :E], y[:, E:]
    r2 = r1 + _bdot(_gelu(gate) * hid, p["w4"]) + p["b4"]
    return r2.reshape(B, T, E)


def make_params(key, E):
    """Conv1D weights ~ N(0, 0.02), stored bf16 for the MXU; LayerNorm gamma=1,
    beta=0 (f32).  Conv1D biases are zero-initialised in the PyTorch module;
    small random values are used here so the bias-add path is exercised."""
    ks = jax.random.split(key, 10)
    wmat = lambda k, shape: (0.02 * jax.random.normal(
        k, shape, dtype=jnp.float32)).astype(jnp.bfloat16)
    bvec = lambda k, n: 0.02 * jax.random.normal(k, (1, n), dtype=jnp.float32)
    return dict(
        ln0_g=jnp.ones((1, E), jnp.float32), ln0_b=jnp.zeros((1, E), jnp.float32),
        w0=wmat(ks[0], (E, 2 * E)), b0=bvec(ks[5], 2 * E),
        w1=wmat(ks[1], (2 * E, 2 * E)), b1=bvec(ks[6], 2 * E),
        w2=wmat(ks[2], (2 * E, E)), b2=bvec(ks[7], E),
        ln1_g=jnp.ones((1, E), jnp.float32), ln1_b=jnp.zeros((1, E), jnp.float32),
        w3=wmat(ks[3], (E, 2 * E)), b3=bvec(ks[8], 2 * E),
        w4=wmat(ks[4], (E, E)), b4=bvec(ks[9], E),
    )


if __name__ == "__main__":
    key = jax.random.PRNGKey(0)
    kx, kp = jax.random.split(key)

    # E=128 keeps the demo small while landing the GeGLU hid/gate split on a
    # 128-lane tile boundary (E % 128 == 0 recommended for real perf runs).
    B, T, E = 2, 8, 128
    x = jax.random.normal(kx, (B, T, E), dtype=jnp.float32)
    params = make_params(kp, E)

    def _run(single_buffer):
        fn = jax.jit(functools.partial(
            gpt2_mlp_multiple_residual, single_buffer_weights=single_buffer))
        out = fn(x, params)
        jax.block_until_ready(out)
        return out

    try:
        out = _run(True)
    except Exception:
        # Fallback: jax/Mosaic build that rejects single-buffered BlockSpecs —
        # rerun with default double-buffered weight specs (correctness first).
        out = _run(False)

    ref = _reference(x, params)
    assert out.shape == (B, T, E)
    max_err = float(jnp.max(jnp.abs(out - ref)))
    assert jnp.allclose(out, ref, atol=3e-3, rtol=3e-3), max_err
    print("KERNEL_OK")
</pallas_src>

<mosaic_0001>
module attributes {stable_mosaic.version = 11 : i64} {
  func.func @_mlp_kernel(%arg0: i32, %arg1: memref<8x128xf32, #tpu.memory_space<vmem>>, %arg2: memref<1x128xf32, #tpu.memory_space<vmem>>, %arg3: memref<1x128xf32, #tpu.memory_space<vmem>>, %arg4: memref<128x256xbf16, #tpu.memory_space<vmem>>, %arg5: memref<1x256xf32, #tpu.memory_space<vmem>>, %arg6: memref<256x256xbf16, #tpu.memory_space<vmem>>, %arg7: memref<1x256xf32, #tpu.memory_space<vmem>>, %arg8: memref<256x128xbf16, #tpu.memory_space<vmem>>, %arg9: memref<1x128xf32, #tpu.memory_space<vmem>>, %arg10: memref<1x128xf32, #tpu.memory_space<vmem>>, %arg11: memref<1x128xf32, #tpu.memory_space<vmem>>, %arg12: memref<128x256xbf16, #tpu.memory_space<vmem>>, %arg13: memref<1x256xf32, #tpu.memory_space<vmem>>, %arg14: memref<128x128xbf16, #tpu.memory_space<vmem>>, %arg15: memref<1x128xf32, #tpu.memory_space<vmem>>, %arg16: memref<8x128xf32, #tpu.memory_space<vmem>>) attributes {dimension_semantics = [#tpu.dimension_semantics<parallel>], iteration_bounds = array<i64: 2>, scalar_prefetch = 0 : i64, scratch_operands = 0 : i64, tpu.core_type = #tpu.core_type<tc>, window_params = [{transform_indices = @transform_0, window_bounds = array<i64: 8, 128>}, {pipeline_mode = #tpu.pipeline_mode<synchronous>, transform_indices = @transform_1, window_bounds = array<i64: 1, 128>}, {pipeline_mode = #tpu.pipeline_mode<synchronous>, transform_indices = @transform_2, window_bounds = array<i64: 1, 128>}, {pipeline_mode = #tpu.pipeline_mode<synchronous>, transform_indices = @transform_3, window_bounds = array<i64: 128, 256>}, {pipeline_mode = #tpu.pipeline_mode<synchronous>, transform_indices = @transform_4, window_bounds = array<i64: 1, 256>}, {pipeline_mode = #tpu.pipeline_mode<synchronous>, transform_indices = @transform_5, window_bounds = array<i64: 256, 256>}, {pipeline_mode = #tpu.pipeline_mode<synchronous>, transform_indices = @transform_6, window_bounds = array<i64: 1, 256>}, {pipeline_mode = #tpu.pipeline_mode<synchronous>, transform_indices = @transform_7, window_bounds = array<i64: 256, 128>}, {pipeline_mode = #tpu.pipeline_mode<synchronous>, transform_indices = @transform_8, window_bounds = array<i64: 1, 128>}, {pipeline_mode = #tpu.pipeline_mode<synchronous>, transform_indices = @transform_9, window_bounds = array<i64: 1, 128>}, {pipeline_mode = #tpu.pipeline_mode<synchronous>, transform_indices = @transform_10, window_bounds = array<i64: 1, 128>}, {pipeline_mode = #tpu.pipeline_mode<synchronous>, transform_indices = @transform_11, window_bounds = array<i64: 128, 256>}, {pipeline_mode = #tpu.pipeline_mode<synchronous>, transform_indices = @transform_12, window_bounds = array<i64: 1, 256>}, {pipeline_mode = #tpu.pipeline_mode<synchronous>, transform_indices = @transform_13, window_bounds = array<i64: 128, 128>}, {pipeline_mode = #tpu.pipeline_mode<synchronous>, transform_indices = @transform_14, window_bounds = array<i64: 1, 128>}, {transform_indices = @transform_15, window_bounds = array<i64: 8, 128>}]} {
    %c0 = arith.constant 0 : index
    %c0_0 = arith.constant 0 : index
    %0 = vector.load %arg1[%c0, %c0_0] : memref<8x128xf32, #tpu.memory_space<vmem>>, vector<8x128xf32>
    %c0_1 = arith.constant 0 : index
    %c0_2 = arith.constant 0 : index
    %1 = vector.load %arg2[%c0_1, %c0_2] : memref<1x128xf32, #tpu.memory_space<vmem>>, vector<1x128xf32>
    %c0_3 = arith.constant 0 : index
    %c0_4 = arith.constant 0 : index
    %2 = vector.load %arg3[%c0_3, %c0_4] : memref<1x128xf32, #tpu.memory_space<vmem>>, vector<1x128xf32>
    %cst = arith.constant dense<0.000000e+00> : vector<8xf32>
    %3 = vector.multi_reduction <add>, %0, %cst [1] : vector<8x128xf32> to vector<8xf32>
    %4 = vector.shape_cast %3 : vector<8xf32> to vector<8x1xf32>
    %cst_5 = arith.constant 1.280000e+02 : f32
    %5 = vector.broadcast %cst_5 : f32 to vector<8x1xf32>
    %6 = arith.divf %4, %5 : vector<8x1xf32>
    %7 = vector.broadcast %6 : vector<8x1xf32> to vector<8x128xf32>
    %8 = arith.subf %0, %7 : vector<8x128xf32>
    %9 = arith.mulf %8, %8 : vector<8x128xf32>
    %cst_6 = arith.constant dense<0.000000e+00> : vector<8xf32>
    %10 = vector.multi_reduction <add>, %9, %cst_6 [1] : vector<8x128xf32> to vector<8xf32>
    %11 = vector.shape_cast %10 : vector<8xf32> to vector<8x1xf32>
    %cst_7 = arith.constant 1.280000e+02 : f32
    %12 = vector.broadcast %cst_7 : f32 to vector<8x1xf32>
    %13 = arith.divf %11, %12 : vector<8x1xf32>
    %cst_8 = arith.constant 9.99999974E-6 : f32
    %14 = vector.broadcast %cst_8 : f32 to vector<8x1xf32>
    %15 = arith.addf %13, %14 : vector<8x1xf32>
    %16 = math.rsqrt %15 : vector<8x1xf32>
    %17 = vector.broadcast %16 : vector<8x1xf32> to vector<8x128xf32>
    %18 = arith.mulf %8, %17 : vector<8x128xf32>
    %19 = vector.broadcast %1 : vector<1x128xf32> to vector<8x128xf32>
    %20 = arith.mulf %18, %19 : vector<8x128xf32>
    %21 = vector.broadcast %2 : vector<1x128xf32> to vector<8x128xf32>
    %22 = arith.addf %20, %21 : vector<8x128xf32>
    %c0_9 = arith.constant 0 : index
    %c0_10 = arith.constant 0 : index
    %23 = vector.load %arg4[%c0_9, %c0_10] : memref<128x256xbf16, #tpu.memory_space<vmem>>, vector<128x256xbf16>
    %24 = arith.truncf %22 : vector<8x128xf32> to vector<8x128xbf16>
    %cst_11 = arith.constant dense<0.000000e+00> : vector<8x256xf32>
    %25 = tpu.matmul %24, %23, %cst_11 {dimension_numbers = #tpu.dot_dimension_numbers<[1], [0], [0], [1], [0, 0, 1, 1], [], []>} : vector<8x128xbf16>, vector<128x256xbf16>, vector<8x256xf32> -> vector<8x256xf32>
    %c0_12 = arith.constant 0 : index
    %c0_13 = arith.constant 0 : index
    %26 = vector.load %arg5[%c0_12, %c0_13] : memref<1x256xf32, #tpu.memory_space<vmem>>, vector<1x256xf32>
    %27 = vector.broadcast %26 : vector<1x256xf32> to vector<8x256xf32>
    %28 = arith.addf %25, %27 : vector<8x256xf32>
    %cst_14 = arith.constant 5.000000e-01 : f32
    %29 = vector.broadcast %cst_14 : f32 to vector<8x256xf32>
    %30 = arith.mulf %29, %28 : vector<8x256xf32>
    %cst_15 = arith.constant 4.471500e-02 : f32
    %31 = vector.broadcast %cst_15 : f32 to vector<8x256xf32>
    %32 = arith.mulf %31, %28 : vector<8x256xf32>
    %33 = arith.mulf %32, %28 : vector<8x256xf32>
    %34 = arith.mulf %33, %28 : vector<8x256xf32>
    %35 = arith.addf %28, %34 : vector<8x256xf32>
    %cst_16 = arith.constant 0.797884583 : f32
    %36 = vector.broadcast %cst_16 : f32 to vector<8x256xf32>
    %37 = arith.mulf %36, %35 : vector<8x256xf32>
    %38 = math.tanh %37 : vector<8x256xf32>
    %cst_17 = arith.constant 1.000000e+00 : f32
    %39 = vector.broadcast %cst_17 : f32 to vector<8x256xf32>
    %40 = arith.addf %39, %38 : vector<8x256xf32>
    %41 = arith.mulf %30, %40 : vector<8x256xf32>
    %42 = arith.truncf %41 : vector<8x256xf32> to vector<8x256xbf16>
    %c0_18 = arith.constant 0 : index
    %c0_19 = arith.constant 0 : index
    %43 = vector.load %arg6[%c0_18, %c0_19] : memref<256x256xbf16, #tpu.memory_space<vmem>>, vector<256x256xbf16>
    %cst_20 = arith.constant dense<0.000000e+00> : vector<8x256xf32>
    %44 = tpu.matmul %42, %43, %cst_20 {dimension_numbers = #tpu.dot_dimension_numbers<[1], [0], [0], [1], [0, 0, 1, 1], [], []>} : vector<8x256xbf16>, vector<256x256xbf16>, vector<8x256xf32> -> vector<8x256xf32>
    %c0_21 = arith.constant 0 : index
    %c0_22 = arith.constant 0 : index
    %45 = vector.load %arg7[%c0_21, %c0_22] : memref<1x256xf32, #tpu.memory_space<vmem>>, vector<1x256xf32>
    %46 = vector.broadcast %45 : vector<1x256xf32> to vector<8x256xf32>
    %47 = arith.addf %44, %46 : vector<8x256xf32>
    %cst_23 = arith.constant 5.000000e-01 : f32
    %48 = vector.broadcast %cst_23 : f32 to vector<8x256xf32>
    %49 = arith.mulf %48, %47 : vector<8x256xf32>
    %cst_24 = arith.constant 4.471500e-02 : f32
    %50 = vector.broadcast %cst_24 : f32 to vector<8x256xf32>
    %51 = arith.mulf %50, %47 : vector<8x256xf32>
    %52 = arith.mulf %51, %47 : vector<8x256xf32>
    %53 = arith.mulf %52, %47 : vector<8x256xf32>
    %54 = arith.addf %47, %53 : vector<8x256xf32>
    %cst_25 = arith.constant 0.797884583 : f32
    %55 = vector.broadcast %cst_25 : f32 to vector<8x256xf32>
    %56 = arith.mulf %55, %54 : vector<8x256xf32>
    %57 = math.tanh %56 : vector<8x256xf32>
    %cst_26 = arith.constant 1.000000e+00 : f32
    %58 = vector.broadcast %cst_26 : f32 to vector<8x256xf32>
    %59 = arith.addf %58, %57 : vector<8x256xf32>
    %60 = arith.mulf %49, %59 : vector<8x256xf32>
    %61 = arith.truncf %60 : vector<8x256xf32> to vector<8x256xbf16>
    %c0_27 = arith.constant 0 : index
    %c0_28 = arith.constant 0 : index
    %62 = vector.load %arg8[%c0_27, %c0_28] : memref<256x128xbf16, #tpu.memory_space<vmem>>, vector<256x128xbf16>
    %cst_29 = arith.constant dense<0.000000e+00> : vector<8x128xf32>
    %63 = tpu.matmul %61, %62, %cst_29 {dimension_numbers = #tpu.dot_dimension_numbers<[1], [0], [0], [1], [0, 0, 1, 1], [], []>} : vector<8x256xbf16>, vector<256x128xbf16>, vector<8x128xf32> -> vector<8x128xf32>
    %64 = arith.addf %0, %63 : vector<8x128xf32>
    %c0_30 = arith.constant 0 : index
    %c0_31 = arith.constant 0 : index
    %65 = vector.load %arg9[%c0_30, %c0_31] : memref<1x128xf32, #tpu.memory_space<vmem>>, vector<1x128xf32>
    %66 = vector.broadcast %65 : vector<1x128xf32> to vector<8x128xf32>
    %67 = arith.addf %64, %66 : vector<8x128xf32>
    %c0_32 = arith.constant 0 : index
    %c0_33 = arith.constant 0 : index
    %68 = vector.load %arg10[%c0_32, %c0_33] : memref<1x128xf32, #tpu.memory_space<vmem>>, vector<1x128xf32>
    %c0_34 = arith.constant 0 : index
    %c0_35 = arith.constant 0 : index
    %69 = vector.load %arg11[%c0_34, %c0_35] : memref<1x128xf32, #tpu.memory_space<vmem>>, vector<1x128xf32>
    %cst_36 = arith.constant dense<0.000000e+00> : vector<8xf32>
    %70 = vector.multi_reduction <add>, %67, %cst_36 [1] : vector<8x128xf32> to vector<8xf32>
    %71 = vector.shape_cast %70 : vector<8xf32> to vector<8x1xf32>
    %cst_37 = arith.constant 1.280000e+02 : f32
    %72 = vector.broadcast %cst_37 : f32 to vector<8x1xf32>
    %73 = arith.divf %71, %72 : vector<8x1xf32>
    %74 = vector.broadcast %73 : vector<8x1xf32> to vector<8x128xf32>
    %75 = arith.subf %67, %74 : vector<8x128xf32>
    %76 = arith.mulf %75, %75 : vector<8x128xf32>
    %cst_38 = arith.constant dense<0.000000e+00> : vector<8xf32>
    %77 = vector.multi_reduction <add>, %76, %cst_38 [1] : vector<8x128xf32> to vector<8xf32>
    %78 = vector.shape_cast %77 : vector<8xf32> to vector<8x1xf32>
    %cst_39 = arith.constant 1.280000e+02 : f32
    %79 = vector.broadcast %cst_39 : f32 to vector<8x1xf32>
    %80 = arith.divf %78, %79 : vector<8x1xf32>
    %cst_40 = arith.constant 9.99999974E-6 : f32
    %81 = vector.broadcast %cst_40 : f32 to vector<8x1xf32>
    %82 = arith.addf %80, %81 : vector<8x1xf32>
    %83 = math.rsqrt %82 : vector<8x1xf32>
    %84 = vector.broadcast %83 : vector<8x1xf32> to vector<8x128xf32>
    %85 = arith.mulf %75, %84 : vector<8x128xf32>
    %86 = vector.broadcast %68 : vector<1x128xf32> to vector<8x128xf32>
    %87 = arith.mulf %85, %86 : vector<8x128xf32>
    %88 = vector.broadcast %69 : vector<1x128xf32> to vector<8x128xf32>
    %89 = arith.addf %87, %88 : vector<8x128xf32>
    %c0_41 = arith.constant 0 : index
    %c0_42 = arith.constant 0 : index
    %90 = vector.load %arg12[%c0_41, %c0_42] : memref<128x256xbf16, #tpu.memory_space<vmem>>, vector<128x256xbf16>
    %91 = arith.truncf %89 : vector<8x128xf32> to vector<8x128xbf16>
    %cst_43 = arith.constant dense<0.000000e+00> : vector<8x256xf32>
    %92 = tpu.matmul %91, %90, %cst_43 {dimension_numbers = #tpu.dot_dimension_numbers<[1], [0], [0], [1], [0, 0, 1, 1], [], []>} : vector<8x128xbf16>, vector<128x256xbf16>, vector<8x256xf32> -> vector<8x256xf32>
    %c0_44 = arith.constant 0 : index
    %c0_45 = arith.constant 0 : index
    %93 = vector.load %arg13[%c0_44, %c0_45] : memref<1x256xf32, #tpu.memory_space<vmem>>, vector<1x256xf32>
    %94 = vector.broadcast %93 : vector<1x256xf32> to vector<8x256xf32>
    %95 = arith.addf %92, %94 : vector<8x256xf32>
    %96 = vector.extract_strided_slice %95 {offsets = [0, 0], sizes = [8, 128], strides = [1, 1]} : vector<8x256xf32> to vector<8x128xf32>
    %97 = vector.extract_strided_slice %95 {offsets = [0, 128], sizes = [8, 128], strides = [1, 1]} : vector<8x256xf32> to vector<8x128xf32>
    %cst_46 = arith.constant 5.000000e-01 : f32
    %98 = vector.broadcast %cst_46 : f32 to vector<8x128xf32>
    %99 = arith.mulf %98, %97 : vector<8x128xf32>
    %cst_47 = arith.constant 4.471500e-02 : f32
    %100 = vector.broadcast %cst_47 : f32 to vector<8x128xf32>
    %101 = arith.mulf %100, %97 : vector<8x128xf32>
    %102 = arith.mulf %101, %97 : vector<8x128xf32>
    %103 = arith.mulf %102, %97 : vector<8x128xf32>
    %104 = arith.addf %97, %103 : vector<8x128xf32>
    %cst_48 = arith.constant 0.797884583 : f32
    %105 = vector.broadcast %cst_48 : f32 to vector<8x128xf32>
    %106 = arith.mulf %105, %104 : vector<8x128xf32>
    %107 = math.tanh %106 : vector<8x128xf32>
    %cst_49 = arith.constant 1.000000e+00 : f32
    %108 = vector.broadcast %cst_49 : f32 to vector<8x128xf32>
    %109 = arith.addf %108, %107 : vector<8x128xf32>
    %110 = arith.mulf %99, %109 : vector<8x128xf32>
    %111 = arith.mulf %110, %96 : vector<8x128xf32>
    %112 = arith.truncf %111 : vector<8x128xf32> to vector<8x128xbf16>
    %c0_50 = arith.constant 0 : index
    %c0_51 = arith.constant 0 : index
    %113 = vector.load %arg14[%c0_50, %c0_51] : memref<128x128xbf16, #tpu.memory_space<vmem>>, vector<128x128xbf16>
    %cst_52 = arith.constant dense<0.000000e+00> : vector<8x128xf32>
    %114 = tpu.matmul %112, %113, %cst_52 {dimension_numbers = #tpu.dot_dimension_numbers<[1], [0], [0], [1], [0, 0, 1, 1], [], []>} : vector<8x128xbf16>, vector<128x128xbf16>, vector<8x128xf32> -> vector<8x128xf32>
    %115 = arith.addf %67, %114 : vector<8x128xf32>
    %c0_53 = arith.constant 0 : index
    %c0_54 = arith.constant 0 : index
    %116 = vector.load %arg15[%c0_53, %c0_54] : memref<1x128xf32, #tpu.memory_space<vmem>>, vector<1x128xf32>
    %117 = vector.broadcast %116 : vector<1x128xf32> to vector<8x128xf32>
    %118 = arith.addf %115, %117 : vector<8x128xf32>
    %c0_55 = arith.constant 0 : index
    %c0_56 = arith.constant 0 : index
    %119 = vector.load %arg16[%c0_55, %c0_56] : memref<8x128xf32, #tpu.memory_space<vmem>>, vector<8x128xf32>
    tpu.vector_store %arg16[%c0_55, %c0_56], %118 {strides = array<i32>} : memref<8x128xf32, #tpu.memory_space<vmem>>, vector<8x128xf32>,
    return
  }
  func.func @transform_0(%arg0: i32) -> (i32, i32) {
    %c0_i32 = arith.constant 0 : i32
    %c0_i32_0 = arith.constant 0 : i32
    return %arg0, %c0_i32 : i32, i32
  }
  func.func @transform_1(%arg0: i32) -> (i32, i32) {
    %c0_i32 = arith.constant 0 : i32
    %c0_i32_0 = arith.constant 0 : i32
    %c0_i32_1 = arith.constant 0 : i32
    return %c0_i32, %c0_i32_0 : i32, i32
  }
  func.func @transform_2(%arg0: i32) -> (i32, i32) {
    %c0_i32 = arith.constant 0 : i32
    %c0_i32_0 = arith.constant 0 : i32
    %c0_i32_1 = arith.constant 0 : i32
    return %c0_i32, %c0_i32_0 : i32, i32
  }
  func.func @transform_3(%arg0: i32) -> (i32, i32) {
    %c0_i32 = arith.constant 0 : i32
    %c0_i32_0 = arith.constant 0 : i32
    %c0_i32_1 = arith.constant 0 : i32
    return %c0_i32, %c0_i32_0 : i32, i32
  }
  func.func @transform_4(%arg0: i32) -> (i32, i32) {
    %c0_i32 = arith.constant 0 : i32
    %c0_i32_0 = arith.constant 0 : i32
    %c0_i32_1 = arith.constant 0 : i32
    return %c0_i32, %c0_i32_0 : i32, i32
  }
  func.func @transform_5(%arg0: i32) -> (i32, i32) {
    %c0_i32 = arith.constant 0 : i32
    %c0_i32_0 = arith.constant 0 : i32
    %c0_i32_1 = arith.constant 0 : i32
    return %c0_i32, %c0_i32_0 : i32, i32
  }
  func.func @transform_6(%arg0: i32) -> (i32, i32) {
    %c0_i32 = arith.constant 0 : i32
    %c0_i32_0 = arith.constant 0 : i32
    %c0_i32_1 = arith.constant 0 : i32
    return %c0_i32, %c0_i32_0 : i32, i32
  }
  func.func @transform_7(%arg0: i32) -> (i32, i32) {
    %c0_i32 = arith.constant 0 : i32
    %c0_i32_0 = arith.constant 0 : i32
    %c0_i32_1 = arith.constant 0 : i32
    return %c0_i32, %c0_i32_0 : i32, i32
  }
  func.func @transform_8(%arg0: i32) -> (i32, i32) {
    %c0_i32 = arith.constant 0 : i32
    %c0_i32_0 = arith.constant 0 : i32
    %c0_i32_1 = arith.constant 0 : i32
    return %c0_i32, %c0_i32_0 : i32, i32
  }
  func.func @transform_9(%arg0: i32) -> (i32, i32) {
    %c0_i32 = arith.constant 0 : i32
    %c0_i32_0 = arith.constant 0 : i32
    %c0_i32_1 = arith.constant 0 : i32
    return %c0_i32, %c0_i32_0 : i32, i32
  }
  func.func @transform_10(%arg0: i32) -> (i32, i32) {
    %c0_i32 = arith.constant 0 : i32
    %c0_i32_0 = arith.constant 0 : i32
    %c0_i32_1 = arith.constant 0 : i32
    return %c0_i32, %c0_i32_0 : i32, i32
  }
  func.func @transform_11(%arg0: i32) -> (i32, i32) {
    %c0_i32 = arith.constant 0 : i32
    %c0_i32_0 = arith.constant 0 : i32
    %c0_i32_1 = arith.constant 0 : i32
    return %c0_i32, %c0_i32_0 : i32, i32
  }
  func.func @transform_12(%arg0: i32) -> (i32, i32) {
    %c0_i32 = arith.constant 0 : i32
    %c0_i32_0 = arith.constant 0 : i32
    %c0_i32_1 = arith.constant 0 : i32
    return %c0_i32, %c0_i32_0 : i32, i32
  }
  func.func @transform_13(%arg0: i32) -> (i32, i32) {
    %c0_i32 = arith.constant 0 : i32
    %c0_i32_0 = arith.constant 0 : i32
    %c0_i32_1 = arith.constant 0 : i32
    return %c0_i32, %c0_i32_0 : i32, i32
  }
  func.func @transform_14(%arg0: i32) -> (i32, i32) {
    %c0_i32 = arith.constant 0 : i32
    %c0_i32_0 = arith.constant 0 : i32
    %c0_i32_1 = arith.constant 0 : i32
    return %c0_i32, %c0_i32_0 : i32, i32
  }
  func.func @transform_15(%arg0: i32) -> (i32, i32) {
    %c0_i32 = arith.constant 0 : i32
    %c0_i32_0 = arith.constant 0 : i32
    return %arg0, %c0_i32 : i32, i32
  }
}

module attributes {stable_mosaic.version = 11 : i64} {
  func.func @_mlp_kernel(%arg0: i32, %arg1: memref<8x128xf32, #tpu.memory_space<vmem>>, %arg2: memref<1x128xf32, #tpu.memory_space<vmem>>, %arg3: memref<1x128xf32, #tpu.memory_space<vmem>>, %arg4: memref<128x256xbf16, #tpu.memory_space<vmem>>, %arg5: memref<1x256xf32, #tpu.memory_space<vmem>>, %arg6: memref<256x256xbf16, #tpu.memory_space<vmem>>, %arg7: memref<1x256xf32, #tpu.memory_space<vmem>>, %arg8: memref<256x128xbf16, #tpu.memory_space<vmem>>, %arg9: memref<1x128xf32, #tpu.memory_space<vmem>>, %arg10: memref<1x128xf32, #tpu.memory_space<vmem>>, %arg11: memref<1x128xf32, #tpu.memory_space<vmem>>, %arg12: memref<128x256xbf16, #tpu.memory_space<vmem>>, %arg13: memref<1x256xf32, #tpu.memory_space<vmem>>, %arg14: memref<128x128xbf16, #tpu.memory_space<vmem>>, %arg15: memref<1x128xf32, #tpu.memory_space<vmem>>, %arg16: memref<8x128xf32, #tpu.memory_space<vmem>>) attributes {dimension_semantics = [#tpu.dimension_semantics<parallel>], iteration_bounds = array<i64: 2>, scalar_prefetch = 0 : i64, scratch_operands = 0 : i64, tpu.core_type = #tpu.core_type<tc>, window_params = [{transform_indices = @transform_0, window_bounds = array<i64: 8, 128>}, {pipeline_mode = #tpu.pipeline_mode<synchronous>, transform_indices = @transform_1, window_bounds = array<i64: 1, 128>}, {pipeline_mode = #tpu.pipeline_mode<synchronous>, transform_indices = @transform_2, window_bounds = array<i64: 1, 128>}, {pipeline_mode = #tpu.pipeline_mode<synchronous>, transform_indices = @transform_3, window_bounds = array<i64: 128, 256>}, {pipeline_mode = #tpu.pipeline_mode<synchronous>, transform_indices = @transform_4, window_bounds = array<i64: 1, 256>}, {pipeline_mode = #tpu.pipeline_mode<synchronous>, transform_indices = @transform_5, window_bounds = array<i64: 256, 256>}, {pipeline_mode = #tpu.pipeline_mode<synchronous>, transform_indices = @transform_6, window_bounds = array<i64: 1, 256>}, {pipeline_mode = #tpu.pipeline_mode<synchronous>, transform_indices = @transform_7, window_bounds = array<i64: 256, 128>}, {pipeline_mode = #tpu.pipeline_mode<synchronous>, transform_indices = @transform_8, window_bounds = array<i64: 1, 128>}, {pipeline_mode = #tpu.pipeline_mode<synchronous>, transform_indices = @transform_9, window_bounds = array<i64: 1, 128>}, {pipeline_mode = #tpu.pipeline_mode<synchronous>, transform_indices = @transform_10, window_bounds = array<i64: 1, 128>}, {pipeline_mode = #tpu.pipeline_mode<synchronous>, transform_indices = @transform_11, window_bounds = array<i64: 128, 256>}, {pipeline_mode = #tpu.pipeline_mode<synchronous>, transform_indices = @transform_12, window_bounds = array<i64: 1, 256>}, {pipeline_mode = #tpu.pipeline_mode<synchronous>, transform_indices = @transform_13, window_bounds = array<i64: 128, 128>}, {pipeline_mode = #tpu.pipeline_mode<synchronous>, transform_indices = @transform_14, window_bounds = array<i64: 1, 128>}, {transform_indices = @transform_15, window_bounds = array<i64: 8, 128>}]} {
    %c0 = arith.constant 0 : index
    %c0_0 = arith.constant 0 : index
    %0 = vector.load %arg1[%c0, %c0_0] : memref<8x128xf32, #tpu.memory_space<vmem>>, vector<8x128xf32>
    %c0_1 = arith.constant 0 : index
    %c0_2 = arith.constant 0 : index
    %1 = vector.load %arg2[%c0_1, %c0_2] : memref<1x128xf32, #tpu.memory_space<vmem>>, vector<1x128xf32>
    %c0_3 = arith.constant 0 : index
    %c0_4 = arith.constant 0 : index
    %2 = vector.load %arg3[%c0_3, %c0_4] : memref<1x128xf32, #tpu.memory_space<vmem>>, vector<1x128xf32>
    %cst = arith.constant dense<0.000000e+00> : vector<8xf32>
    %3 = vector.multi_reduction <add>, %0, %cst [1] : vector<8x128xf32> to vector<8xf32>
    %4 = vector.shape_cast %3 : vector<8xf32> to vector<8x1xf32>
    %cst_5 = arith.constant 1.280000e+02 : f32
    %5 = vector.broadcast %cst_5 : f32 to vector<8x1xf32>
    %6 = arith.divf %4, %5 : vector<8x1xf32>
    %7 = vector.broadcast %6 : vector<8x1xf32> to vector<8x128xf32>
    %8 = arith.subf %0, %7 : vector<8x128xf32>
    %9 = arith.mulf %8, %8 : vector<8x128xf32>
    %cst_6 = arith.constant dense<0.000000e+00> : vector<8xf32>
    %10 = vector.multi_reduction <add>, %9, %cst_6 [1] : vector<8x128xf32> to vector<8xf32>
    %11 = vector.shape_cast %10 : vector<8xf32> to vector<8x1xf32>
    %cst_7 = arith.constant 1.280000e+02 : f32
    %12 = vector.broadcast %cst_7 : f32 to vector<8x1xf32>
    %13 = arith.divf %11, %12 : vector<8x1xf32>
    %cst_8 = arith.constant 9.99999974E-6 : f32
    %14 = vector.broadcast %cst_8 : f32 to vector<8x1xf32>
    %15 = arith.addf %13, %14 : vector<8x1xf32>
    %16 = math.rsqrt %15 : vector<8x1xf32>
    %17 = vector.broadcast %16 : vector<8x1xf32> to vector<8x128xf32>
    %18 = arith.mulf %8, %17 : vector<8x128xf32>
    %19 = vector.broadcast %1 : vector<1x128xf32> to vector<8x128xf32>
    %20 = arith.mulf %18, %19 : vector<8x128xf32>
    %21 = vector.broadcast %2 : vector<1x128xf32> to vector<8x128xf32>
    %22 = arith.addf %20, %21 : vector<8x128xf32>
    %c0_9 = arith.constant 0 : index
    %c0_10 = arith.constant 0 : index
    %23 = vector.load %arg4[%c0_9, %c0_10] : memref<128x256xbf16, #tpu.memory_space<vmem>>, vector<128x256xbf16>
    %24 = arith.truncf %22 : vector<8x128xf32> to vector<8x128xbf16>
    %cst_11 = arith.constant dense<0.000000e+00> : vector<8x256xf32>
    %25 = tpu.matmul %24, %23, %cst_11 {dimension_numbers = #tpu.dot_dimension_numbers<[1], [0], [0], [1], [0, 0, 1, 1], [], []>} : vector<8x128xbf16>, vector<128x256xbf16>, vector<8x256xf32> -> vector<8x256xf32>
    %c0_12 = arith.constant 0 : index
    %c0_13 = arith.constant 0 : index
    %26 = vector.load %arg5[%c0_12, %c0_13] : memref<1x256xf32, #tpu.memory_space<vmem>>, vector<1x256xf32>
    %27 = vector.broadcast %26 : vector<1x256xf32> to vector<8x256xf32>
    %28 = arith.addf %25, %27 : vector<8x256xf32>
    %cst_14 = arith.constant 5.000000e-01 : f32
    %29 = vector.broadcast %cst_14 : f32 to vector<8x256xf32>
    %30 = arith.mulf %29, %28 : vector<8x256xf32>
    %cst_15 = arith.constant 4.471500e-02 : f32
    %31 = vector.broadcast %cst_15 : f32 to vector<8x256xf32>
    %32 = arith.mulf %31, %28 : vector<8x256xf32>
    %33 = arith.mulf %32, %28 : vector<8x256xf32>
    %34 = arith.mulf %33, %28 : vector<8x256xf32>
    %35 = arith.addf %28, %34 : vector<8x256xf32>
    %cst_16 = arith.constant 0.797884583 : f32
    %36 = vector.broadcast %cst_16 : f32 to vector<8x256xf32>
    %37 = arith.mulf %36, %35 : vector<8x256xf32>
    %38 = math.tanh %37 : vector<8x256xf32>
    %cst_17 = arith.constant 1.000000e+00 : f32
    %39 = vector.broadcast %cst_17 : f32 to vector<8x256xf32>
    %40 = arith.addf %39, %38 : vector<8x256xf32>
    %41 = arith.mulf %30, %40 : vector<8x256xf32>
    %42 = arith.truncf %41 : vector<8x256xf32> to vector<8x256xbf16>
    %c0_18 = arith.constant 0 : index
    %c0_19 = arith.constant 0 : index
    %43 = vector.load %arg6[%c0_18, %c0_19] : memref<256x256xbf16, #tpu.memory_space<vmem>>, vector<256x256xbf16>
    %cst_20 = arith.constant dense<0.000000e+00> : vector<8x256xf32>
    %44 = tpu.matmul %42, %43, %cst_20 {dimension_numbers = #tpu.dot_dimension_numbers<[1], [0], [0], [1], [0, 0, 1, 1], [], []>} : vector<8x256xbf16>, vector<256x256xbf16>, vector<8x256xf32> -> vector<8x256xf32>
    %c0_21 = arith.constant 0 : index
    %c0_22 = arith.constant 0 : index
    %45 = vector.load %arg7[%c0_21, %c0_22] : memref<1x256xf32, #tpu.memory_space<vmem>>, vector<1x256xf32>
    %46 = vector.broadcast %45 : vector<1x256xf32> to vector<8x256xf32>
    %47 = arith.addf %44, %46 : vector<8x256xf32>
    %cst_23 = arith.constant 5.000000e-01 : f32
    %48 = vector.broadcast %cst_23 : f32 to vector<8x256xf32>
    %49 = arith.mulf %48, %47 : vector<8x256xf32>
    %cst_24 = arith.constant 4.471500e-02 : f32
    %50 = vector.broadcast %cst_24 : f32 to vector<8x256xf32>
    %51 = arith.mulf %50, %47 : vector<8x256xf32>
    %52 = arith.mulf %51, %47 : vector<8x256xf32>
    %53 = arith.mulf %52, %47 : vector<8x256xf32>
    %54 = arith.addf %47, %53 : vector<8x256xf32>
    %cst_25 = arith.constant 0.797884583 : f32
    %55 = vector.broadcast %cst_25 : f32 to vector<8x256xf32>
    %56 = arith.mulf %55, %54 : vector<8x256xf32>
    %57 = math.tanh %56 : vector<8x256xf32>
    %cst_26 = arith.constant 1.000000e+00 : f32
    %58 = vector.broadcast %cst_26 : f32 to vector<8x256xf32>
    %59 = arith.addf %58, %57 : vector<8x256xf32>
    %60 = arith.mulf %49, %59 : vector<8x256xf32>
    %61 = arith.truncf %60 : vector<8x256xf32> to vector<8x256xbf16>
    %c0_27 = arith.constant 0 : index
    %c0_28 = arith.constant 0 : index
    %62 = vector.load %arg8[%c0_27, %c0_28] : memref<256x128xbf16, #tpu.memory_space<vmem>>, vector<256x128xbf16>
    %cst_29 = arith.constant dense<0.000000e+00> : vector<8x128xf32>
    %63 = tpu.matmul %61, %62, %cst_29 {dimension_numbers = #tpu.dot_dimension_numbers<[1], [0], [0], [1], [0, 0, 1, 1], [], []>} : vector<8x256xbf16>, vector<256x128xbf16>, vector<8x128xf32> -> vector<8x128xf32>
    %64 = arith.addf %0, %63 : vector<8x128xf32>
    %c0_30 = arith.constant 0 : index
    %c0_31 = arith.constant 0 : index
    %65 = vector.load %arg9[%c0_30, %c0_31] : memref<1x128xf32, #tpu.memory_space<vmem>>, vector<1x128xf32>
    %66 = vector.broadcast %65 : vector<1x128xf32> to vector<8x128xf32>
    %67 = arith.addf %64, %66 : vector<8x128xf32>
    %c0_32 = arith.constant 0 : index
    %c0_33 = arith.constant 0 : index
    %68 = vector.load %arg10[%c0_32, %c0_33] : memref<1x128xf32, #tpu.memory_space<vmem>>, vector<1x128xf32>
    %c0_34 = arith.constant 0 : index
    %c0_35 = arith.constant 0 : index
    %69 = vector.load %arg11[%c0_34, %c0_35] : memref<1x128xf32, #tpu.memory_space<vmem>>, vector<1x128xf32>
    %cst_36 = arith.constant dense<0.000000e+00> : vector<8xf32>
    %70 = vector.multi_reduction <add>, %67, %cst_36 [1] : vector<8x128xf32> to vector<8xf32>
    %71 = vector.shape_cast %70 : vector<8xf32> to vector<8x1xf32>
    %cst_37 = arith.constant 1.280000e+02 : f32
    %72 = vector.broadcast %cst_37 : f32 to vector<8x1xf32>
    %73 = arith.divf %71, %72 : vector<8x1xf32>
    %74 = vector.broadcast %73 : vector<8x1xf32> to vector<8x128xf32>
    %75 = arith.subf %67, %74 : vector<8x128xf32>
    %76 = arith.mulf %75, %75 : vector<8x128xf32>
    %cst_38 = arith.constant dense<0.000000e+00> : vector<8xf32>
    %77 = vector.multi_reduction <add>, %76, %cst_38 [1] : vector<8x128xf32> to vector<8xf32>
    %78 = vector.shape_cast %77 : vector<8xf32> to vector<8x1xf32>
    %cst_39 = arith.constant 1.280000e+02 : f32
    %79 = vector.broadcast %cst_39 : f32 to vector<8x1xf32>
    %80 = arith.divf %78, %79 : vector<8x1xf32>
    %cst_40 = arith.constant 9.99999974E-6 : f32
    %81 = vector.broadcast %cst_40 : f32 to vector<8x1xf32>
    %82 = arith.addf %80, %81 : vector<8x1xf32>
    %83 = math.rsqrt %82 : vector<8x1xf32>
    %84 = vector.broadcast %83 : vector<8x1xf32> to vector<8x128xf32>
    %85 = arith.mulf %75, %84 : vector<8x128xf32>
    %86 = vector.broadcast %68 : vector<1x128xf32> to vector<8x128xf32>
    %87 = arith.mulf %85, %86 : vector<8x128xf32>
    %88 = vector.broadcast %69 : vector<1x128xf32> to vector<8x128xf32>
    %89 = arith.addf %87, %88 : vector<8x128xf32>
    %c0_41 = arith.constant 0 : index
    %c0_42 = arith.constant 0 : index
    %90 = vector.load %arg12[%c0_41, %c0_42] : memref<128x256xbf16, #tpu.memory_space<vmem>>, vector<128x256xbf16>
    %91 = arith.truncf %89 : vector<8x128xf32> to vector<8x128xbf16>
    %cst_43 = arith.constant dense<0.000000e+00> : vector<8x256xf32>
    %92 = tpu.matmul %91, %90, %cst_43 {dimension_numbers = #tpu.dot_dimension_numbers<[1], [0], [0], [1], [0, 0, 1, 1], [], []>} : vector<8x128xbf16>, vector<128x256xbf16>, vector<8x256xf32> -> vector<8x256xf32>
    %c0_44 = arith.constant 0 : index
    %c0_45 = arith.constant 0 : index
    %93 = vector.load %arg13[%c0_44, %c0_45] : memref<1x256xf32, #tpu.memory_space<vmem>>, vector<1x256xf32>
    %94 = vector.broadcast %93 : vector<1x256xf32> to vector<8x256xf32>
    %95 = arith.addf %92, %94 : vector<8x256xf32>
    %96 = vector.extract_strided_slice %95 {offsets = [0, 0], sizes = [8, 128], strides = [1, 1]} : vector<8x256xf32> to vector<8x128xf32>
    %97 = vector.extract_strided_slice %95 {offsets = [0, 128], sizes = [8, 128], strides = [1, 1]} : vector<8x256xf32> to vector<8x128xf32>
    %cst_46 = arith.constant 5.000000e-01 : f32
    %98 = vector.broadcast %cst_46 : f32 to vector<8x128xf32>
    %99 = arith.mulf %98, %97 : vector<8x128xf32>
    %cst_47 = arith.constant 4.471500e-02 : f32
    %100 = vector.broadcast %cst_47 : f32 to vector<8x128xf32>
    %101 = arith.mulf %100, %97 : vector<8x128xf32>
    %102 = arith.mulf %101, %97 : vector<8x128xf32>
    %103 = arith.mulf %102, %97 : vector<8x128xf32>
    %104 = arith.addf %97, %103 : vector<8x128xf32>
    %cst_48 = arith.constant 0.797884583 : f32
    %105 = vector.broadcast %cst_48 : f32 to vector<8x128xf32>
    %106 = arith.mulf %105, %104 : vector<8x128xf32>
    %107 = math.tanh %106 : vector<8x128xf32>
    %cst_49 = arith.constant 1.000000e+00 : f32
    %108 = vector.broadcast %cst_49 : f32 to vector<8x128xf32>
    %109 = arith.addf %108, %107 : vector<8x128xf32>
    %110 = arith.mulf %99, %109 : vector<8x128xf32>
    %111 = arith.mulf %110, %96 : vector<8x128xf32>
    %112 = arith.truncf %111 : vector<8x128xf32> to vector<8x128xbf16>
    %c0_50 = arith.constant 0 : index
    %c0_51 = arith.constant 0 : index
    %113 = vector.load %arg14[%c0_50, %c0_51] : memref<128x128xbf16, #tpu.memory_space<vmem>>, vector<128x128xbf16>
    %cst_52 = arith.constant dense<0.000000e+00> : vector<8x128xf32>
    %114 = tpu.matmul %112, %113, %cst_52 {dimension_numbers = #tpu.dot_dimension_numbers<[1], [0], [0], [1], [0, 0, 1, 1], [], []>} : vector<8x128xbf16>, vector<128x128xbf16>, vector<8x128xf32> -> vector<8x128xf32>
    %115 = arith.addf %67, %114 : vector<8x128xf32>
    %c0_53 = arith.constant 0 : index
    %c0_54 = arith.constant 0 : index
    %116 = vector.load %arg15[%c0_53, %c0_54] : memref<1x128xf32, #tpu.memory_space<vmem>>, vector<1x128xf32>
    %117 = vector.broadcast %116 : vector<1x128xf32> to vector<8x128xf32>
    %118 = arith.addf %115, %117 : vector<8x128xf32>
    %c0_55 = arith.constant 0 : index
    %c0_56 = arith.constant 0 : index
    %119 = vector.load %arg16[%c0_55, %c0_56] : memref<8x128xf32, #tpu.memory_space<vmem>>, vector<8x128xf32>
    tpu.vector_store %arg16[%c0_55, %c0_56], %118 {strides = array<i32>} : memref<8x128xf32, #tpu.memory_space<vmem>>, vector<8x128xf32>,
    return
  }
  func.func @transform_0(%arg0: i32) -> (i32, i32) {
    %c0_i32 = arith.constant 0 : i32
    %c0_i32_0 = arith.constant 0 : i32
    return %arg0, %c0_i32 : i32, i32
  }
  func.func @transform_1(%arg0: i32) -> (i32, i32) {
    %c0_i32 = arith.constant 0 : i32
    %c0_i32_0 = arith.constant 0 : i32
    %c0_i32_1 = arith.constant 0 : i32
    return %c0_i32, %c0_i32_0 : i32, i32
  }
  func.func @transform_2(%arg0: i32) -> (i32, i32) {
    %c0_i32 = arith.constant 0 : i32
    %c0_i32_0 = arith.constant 0 : i32
    %c0_i32_1 = arith.constant 0 : i32
    return %c0_i32, %c0_i32_0 : i32, i32
  }
  func.func @transform_3(%arg0: i32) -> (i32, i32) {
    %c0_i32 = arith.constant 0 : i32
    %c0_i32_0 = arith.constant 0 : i32
    %c0_i32_1 = arith.constant 0 : i32
    return %c0_i32, %c0_i32_0 : i32, i32
  }
  func.func @transform_4(%arg0: i32) -> (i32, i32) {
    %c0_i32 = arith.constant 0 : i32
    %c0_i32_0 = arith.constant 0 : i32
    %c0_i32_1 = arith.constant 0 : i32
    return %c0_i32, %c0_i32_0 : i32, i32
  }
  func.func @transform_5(%arg0: i32) -> (i32, i32) {
    %c0_i32 = arith.constant 0 : i32
    %c0_i32_0 = arith.constant 0 : i32
    %c0_i32_1 = arith.constant 0 : i32
    return %c0_i32, %c0_i32_0 : i32, i32
  }
  func.func @transform_6(%arg0: i32) -> (i32, i32) {
    %c0_i32 = arith.constant 0 : i32
    %c0_i32_0 = arith.constant 0 : i32
    %c0_i32_1 = arith.constant 0 : i32
    return %c0_i32, %c0_i32_0 : i32, i32
  }
  func.func @transform_7(%arg0: i32) -> (i32, i32) {
    %c0_i32 = arith.constant 0 : i32
    %c0_i32_0 = arith.constant 0 : i32
    %c0_i32_1 = arith.constant 0 : i32
    return %c0_i32, %c0_i32_0 : i32, i32
  }
  func.func @transform_8(%arg0: i32) -> (i32, i32) {
    %c0_i32 = arith.constant 0 : i32
    %c0_i32_0 = arith.constant 0 : i32
    %c0_i32_1 = arith.constant 0 : i32
    return %c0_i32, %c0_i32_0 : i32, i32
  }
  func.func @transform_9(%arg0: i32) -> (i32, i32) {
    %c0_i32 = arith.constant 0 : i32
    %c0_i32_0 = arith.constant 0 : i32
    %c0_i32_1 = arith.constant 0 : i32
    return %c0_i32, %c0_i32_0 : i32, i32
  }
  func.func @transform_10(%arg0: i32) -> (i32, i32) {
    %c0_i32 = arith.constant 0 : i32
    %c0_i32_0 = arith.constant 0 : i32
    %c0_i32_1 = arith.constant 0 : i32
    return %c0_i32, %c0_i32_0 : i32, i32
  }
  func.func @transform_11(%arg0: i32) -> (i32, i32) {
    %c0_i32 = arith.constant 0 : i32
    %c0_i32_0 = arith.constant 0 : i32
    %c0_i32_1 = arith.constant 0 : i32
    return %c0_i32, %c0_i32_0 : i32, i32
  }
  func.func @transform_12(%arg0: i32) -> (i32, i32) {
    %c0_i32 = arith.constant 0 : i32
    %c0_i32_0 = arith.constant 0 : i32
    %c0_i32_1 = arith.constant 0 : i32
    return %c0_i32, %c0_i32_0 : i32, i32
  }
  func.func @transform_13(%arg0: i32) -> (i32, i32) {
    %c0_i32 = arith.constant 0 : i32
    %c0_i32_0 = arith.constant 0 : i32
    %c0_i32_1 = arith.constant 0 : i32
    return %c0_i32, %c0_i32_0 : i32, i32
  }
  func.func @transform_14(%arg0: i32) -> (i32, i32) {
    %c0_i32 = arith.constant 0 : i32
    %c0_i32_0 = arith.constant 0 : i32
    %c0_i32_1 = arith.constant 0 : i32
    return %c0_i32, %c0_i32_0 : i32, i32
  }
  func.func @transform_15(%arg0: i32) -> (i32, i32) {
    %c0_i32 = arith.constant 0 : i32
    %c0_i32_0 = arith.constant 0 : i32
    return %arg0, %c0_i32 : i32, i32
  }
}

</mosaic_0001>

<bundles_post_ra>
// kernel: gpt2_mlp_multiple_residual.1
= control target key start
LH: loop header
LB: loop body
LE: loop exit
PB: predicated region body
PF: predicated region fallthrough
CT: control target
= control target key end

     0   :  { %s2992_s0 = inlined_call_operand.hbm [shape: f32[16,128], index: 0, kind: input, shape index: {}]   ;;  %s2993_s1 = inlined_call_operand.vmem [shape: f32[1,128], index: 1, kind: input, shape index: {}]   ;;  %s2994_s2 = inlined_call_operand.vmem [shape: f32[1,128], index: 2, kind: input, shape index: {}]   ;;  %s2995_s3 = inlined_call_operand.hbm [shape: bf16[128,256], index: 3, kind: input, shape index: {}]   ;;  %s2996_s4 = inlined_call_operand.hbm [shape: f32[1,256], index: 4, kind: input, shape index: {}]   ;;  %s2997_s5 = inlined_call_operand.hbm [shape: bf16[256,256], index: 5, kind: input, shape index: {}]   ;;  %s2998_s6 = inlined_call_operand.vmem [shape: f32[1,256], index: 6, kind: input, shape index: {}]   ;;  %s2999_s7 = inlined_call_operand.hbm [shape: bf16[256,128], index: 7, kind: input, shape index: {}]   ;;  %s3000_s8 = inlined_call_operand.hbm [shape: f32[1,128], index: 8, kind: input, shape index: {}]   ;;  %s3001_s9 = inlined_call_operand.vmem [shape: f32[1,128], index: 9, kind: input, shape index: {}]   ;;  %s3002_s10 = inlined_call_operand.vmem [shape: f32[1,128], index: 10, kind: input, shape index: {}]   ;;  %s3003_s11 = inlined_call_operand.hbm [shape: bf16[128,256], index: 11, kind: input, shape index: {}]   ;;  %s3004_s12 = inlined_call_operand.vmem [shape: f32[1,256], index: 12, kind: input, shape index: {}]   ;;  %s3005_s13 = inlined_call_operand.hbm [shape: bf16[128,128], index: 13, kind: input, shape index: {}]   ;;  %s3006_s14 = inlined_call_operand.hbm [shape: f32[1,128], index: 14, kind: input, shape index: {}]   ;;  %s3007_s15 = inlined_call_operand.hbm [shape: f32[16,128], index: 15, kind: output, shape index: {}]  }
   0x1   :  { %3010 = sst [smem:[#allocation24_spill]] %s2995_s3 }
   0x2   :  { %3011 = sst [smem:[#allocation25_spill]] %s2996_s4 }
   0x3   :  { %3012 = sst [smem:[#allocation26_spill]] %s2997_s5 }
   0x4   :  { %3013 = sst [smem:[#allocation27_spill]] %s2999_s7 }
   0x5   :  { %3014 = sst [smem:[#allocation28_spill]] %s3000_s8 }
   0x6   :  { %3015 = sst [smem:[#allocation29_spill]] %s3001_s9 }
   0x7   :  { %3016 = sst [smem:[#allocation30_spill]] %s3002_s10 }
   0x8   :  { %3017 = sst [smem:[#allocation31_spill]] %s3003_s11 }
   0x9   :  { %3018 = sst [smem:[#allocation32_spill]] %s3004_s12 }
   0xa   :  { %3019 = sst [smem:[#allocation33_spill]] %s3007_s15 }
   0xb   :  { %20 = vsyncpa [#allocation3], 0 }
   0xc   :  { %22 = vsyncpa [#allocation3 + $0x1], 0 }
   0xd   :  { %23 = vsyncpa [#allocation6], 0 }
   0xe   :  { %24 = vsyncpa [#allocation9], 0 }
   0xf   :  { %25 = vsyncpa [#allocation12], 0 }
  0x10   :  { %26 = vsyncpa [#allocation15], 0 }
  0x11   :  { %27 = vsyncpa [#allocation4], 0 }
  0x12   :  { %29 = vsyncpa [#allocation4 + $0x1], 0  ;;  %s2740_s18 = smov 0   ;;  %s2742_s19 = smov 0  }
  0x13   :  { %s2744_s20 = smov 0   ;;  %s2746_s21 = smov 0  }
  0x14 LB: > { %s3020_s3 = sld [smem:[#allocation24_spill]]  ;;  %s2764_s25 = sadd.s32 4294967295, %s2645_s21   ;;  %s2645_s21 = sphi %s2746_s21, %s3042_s21   ;;  %s2641_s20 = sphi %s2744_s20, %s3041_s20   ;;  %s2637_s19 = sphi %s2742_s19, %s3040_s19   ;;  %s2633_s18 = sphi %s2740_s18, %s3039_s18  }
  0x15   : > { %p1672_p0 = scmp.ge.s32.totalorder %s2645_s21, 1  ;;  %p56_p1 = scmp.eq.s32.totalorder %s2764_s25, 0 }
  0x16   : > { %p386_p2 = scmp.lt.s32.totalorder %s2645_s21, 3  ;;  %s2647_s27 = smov [#allocation5]  }
  0x17   : > { %s405_s28 = sshll.u32 %s2647_s27, 4  ;;  %s3022_s5 = sld [smem:[#allocation26_spill]]  ;;  %s406_s28 = int_to_ptr.vmem [resolvable:$true] %s405_s28 }
  0x18   : > { %p2769_p3 = pnand %p1672_p0, %p386_p2  ;;  %s3024_s8 = sld [smem:[#allocation28_spill]] }
  0x19   : > { %s3009_s12 = smov 128   ;;  %s2650_s10 = smov 8  }
  0x1a   : > { %s403_s24 = sshll.u32 %s3020_s3, 4  ;;  %p2175_p4 = pneg %p2769_p3  ;;  %s404_s24 = int_to_ptr.hbm [resolvable:$true] %s403_s24 }
  0x1b   : > { %s2648_s3 = smov [#allocation8]   ;;  %s2651_s29 = smov [#allocation11]  }
  0x1c   : > { %p2781_p6 = pnand %p2175_p4, %p56_p1  ;;  %s431_s15 = sshll.u32 %s2648_s3, 4  ;;  %s432_s15 = int_to_ptr.vmem [resolvable:$true] %s431_s15 }
  0x1d   : > { %s429_s16 = sshll.u32 %s3022_s5, 4  ;;  %s463_s30 = sshll.u32 %s2651_s29, 4  ;;  %s430_s16 = int_to_ptr.hbm [resolvable:$true] %s429_s16  ;;  %s464_s30 = int_to_ptr.vmem [resolvable:$true] %s463_s30 }
  0x1e   : > { %s461_s27 = sshll.u32 %s3024_s8, 4  ;;  %s495_s23 = sshll.u32 %s3005_s13, 4  ;;  %s462_s27 = int_to_ptr.hbm [resolvable:$true] %s461_s27  ;;  %s496_s23 = int_to_ptr.hbm [resolvable:$true] %s495_s23 }
  0x1f   : > { %2178 = dma.hbm_to_vmem [thread:$0]  (!%p2781_p6), %s404_s24, 2048, %s406_s28, [#allocation6], %s3009_s12, %s3009_s12, %s2650_s10  }
  0x20   : > { %2184 = dma.hbm_to_vmem [thread:$0]  (!%p2781_p6), %s430_s16, 4096, %s432_s15, [#allocation9], %s3009_s12, %s3009_s12, %s2650_s10  }
  0x21   : > { %2190 = dma.hbm_to_vmem [thread:$0]  (!%p2781_p6), %s462_s27, 16, %s464_s30, [#allocation12]  }
  0x22   : > { %s2652_s24 = smov [#allocation14]   ;;  %s3025_s4 = sld [smem:[#allocation25_spill]] }
  0x23   : > { %s497_s28 = sshll.u32 %s2652_s24, 4  ;;  %s2653_s15 = smov 64   ;;  %s498_s28 = int_to_ptr.vmem [resolvable:$true] %s497_s28 }
  0x24   : > { %s2654_s16 = smov 4   ;;  %s3026_s7 = sld [smem:[#allocation27_spill]] }
  0x25   : > { %2196 = dma.hbm_to_vmem [thread:$0]  (!%p2781_p6), %s496_s23, 1024, %s498_s28, [#allocation15], %s2653_s15, %s2653_s15, %s2654_s16  }
  0x26   : > { %s2655_s12 = smov [#allocation7]   ;;  %s2656_s5 = smov [#allocation10]  }
  0x27   : > { %s420_s27 = sshll.u32 %s2655_s12, 4  ;;  %s448_s8 = sshll.u32 %s2656_s5, 4  ;;  %s421_s27 = int_to_ptr.vmem [resolvable:$true] %s420_s27  ;;  %s449_s8 = int_to_ptr.vmem [resolvable:$true] %s448_s8 }
  0x28   : > { %s418_s9 = sshll.u32 %s3025_s4, 4  ;;  %s3027_s11 = sld [smem:[#allocation31_spill]]  ;;  %s419_s9 = int_to_ptr.hbm [resolvable:$true] %s418_s9 }
  0x29   : > { %2181 = dma.hbm_to_vmem [thread:$0]  (!%p2781_p6), %s419_s9, 32, %s421_s27, [#allocation6]  }
  0x2a   : > { %s446_s3 = sshll.u32 %s3026_s7, 4  ;;  %s510_s9 = sshll.u32 %s3006_s14, 4  ;;  %s447_s3 = int_to_ptr.hbm [resolvable:$true] %s446_s3  ;;  %s511_s9 = int_to_ptr.hbm [resolvable:$true] %s510_s9 }
  0x2b   : > { %2187 = dma.hbm_to_vmem [thread:$0]  (!%p2781_p6), %s447_s3, 2048, %s449_s8, [#allocation9], %s2653_s15, %s2653_s15, %s2654_s16  }
  0x2c   : > { %s2657_s29 = smov [#allocation13]   ;;  %s3028_s27 = smov 128  }
  0x2d   : > { %s480_s22 = sshll.u32 %s2657_s29, 4  ;;  %s2658_s15 = smov [#allocation16]   ;;  %s481_s22 = int_to_ptr.vmem [resolvable:$true] %s480_s22 }
  0x2e   : > { %s478_s23 = sshll.u32 %s3027_s11, 4  ;;  %s512_s16 = sshll.u32 %s2658_s15, 4  ;;  %s479_s23 = int_to_ptr.hbm [resolvable:$true] %s478_s23  ;;  %s513_s16 = int_to_ptr.vmem [resolvable:$true] %s512_s16 }
  0x2f   : > { %2193 = dma.hbm_to_vmem [thread:$0]  (!%p2781_p6), %s479_s23, 2048, %s481_s22, [#allocation12], %s3028_s27, %s3028_s27, %s2650_s10  }
  0x30   : > { %2199 = dma.hbm_to_vmem [thread:$0]  (!%p2781_p6), %s511_s9, 16, %s513_s16, [#allocation15]  }
  0x31   : > { %s1671_s3 = sadd.s32 4294967294, %s2645_s21   ;;  %s2830_s5 = sadd.s32 1, %s2645_s21  }
  0x32   : > { %s39_s8 = ssub.s32 %s2645_s21, %s2830_s5  ;;  %s42_s30 = sadd.s32 1, %s2641_s20 }
  0x33   : > { %p40_p7 = scmp.eq.s32.totalorder %s39_s8, 0  ;;  %p49_p8 = scmp.ne.s32.totalorder %s2641_s20, %s2637_s19 }
  0x34   : > { %p50_p9 = scmp.eq.s32.totalorder %s2645_s21, 0  ;;  %p55_p10 = scmp.ne.s32.totalorder %s2637_s19, %s2633_s18 }
  0x35   : > { %s2841_s10 = scalar_select %p40_p7, %s2641_s20, %s42_s30  }
  0x36   : > { %p2843_p11 = por %p50_p9, %p49_p8  ;;  %p2849_p12 = por %p56_p1, %p55_p10 }
  0x37   : > { %p373_p13 = scmp.eq.s32.totalorder %s2764_s25, 1  ;;  %p379_p0 = scmp.eq.s32.totalorder %s1671_s3, 1 }
  0x38   : > { %p2216_p2 = scmp.lt.s32.totalorder %s2645_s21, 2  ;;  %s523_s23 = sand.u32 1, %s2641_s20  }
  0x39   : > { %p2856_p4 = por %p373_p13, %p49_p8  ;;  %p2860_p6 = por %p379_p0, %p55_p10 }
  0x3a   : > { %s1682_s9 = sshll.u32 %s523_s23, 3  ;;  %s1683_s29 = sshll.u32 %s2645_s21, 3 }
  0x3b   : > { %s531_s15 = scalar_lea.hbm %s2992_s0, %s1683_s29  ;;  %s527_s16 = scalar_lea.vmem [#allocation2], %s1682_s9 }
  0x3c   : > { %s535_s8 = sshll.u32 %s527_s16, 4  ;;  %s533_s30 = sshll.u32 %s531_s15, 4  ;;  %s536_s8 = int_to_ptr.vmem [resolvable:$true] %s535_s8  ;;  %s534_s30 = int_to_ptr.hbm [resolvable:$true] %s533_s30 }
  0x3d   : > { %p2870_p7 = pnand %p2216_p2, %p2843_p11  ;;  %s524_s4 = scalar_lea.sflag [#allocation3], %s523_s23 }
  0x3e   : > { %s2533_s7 = sshra.s32 %s534_s30, 4  ;;  %s2540_s22 = scalar_lea.hbm %s2992_s0, 16  ;;  %s2534_s7 = int_to_ptr.hbm [resolvable:$true] %s2533_s7 }
  0x3f   : > { %s2535_s11 = scalar_lea.hbm %s2534_s7, 8  ;;  %p2537_p9 = pneg %p2870_p7 }
  0x40   : > { %p2536_p8 = scmp.ne.s32.totalorder %s2534_s7, %s2535_s11  ;;  %p2541_p11 = scmp.lt.s32.totalorder %s2534_s7, %s2992_s0 }
  0x41   : > { %p2542_p0 = scmp.lt.s32.totalorder %s2540_s22, %s2535_s11 }
  0x42   : > { %p2538_p10 = pnand %p2537_p9, %p2536_p8 }
  0x43   : > { %p2543_p2 = por %p2542_p0, %p2541_p11 }
  0x44   : > { %p2539_p13 = pneg %p2538_p10 }
  0x46   : > { %p2544_p5 = pnand %p2543_p2, %p2539_p13 }
  0x48   : > { %2547 = shalt.err (!%p2544_p5)
}
  0x49   : > { %2203 = dma.hbm_to_vmem [thread:$0]  (!%p2870_p7), %s534_s30, 128, %s536_s8, %s524_s4  }
  0x4a   : > { %544 = sbr.rel (%p2769_p3) target bundleno = 1366 (0x556), region = 80  ;;  %s2887_s23 = sand.u32 (!%p2769_p3), 1, %s2637_s19  }
  0x4b   : > { %s1685_s15 = sshll.u32 (!%p2769_p3), %s2887_s23, 3  ;;  %s547_s16 = scalar_lea.sflag (!%p2769_p3), [#allocation3], %s2887_s23 }
  0x4c   : > { %s550_s7 = scalar_lea.vmem (!%p2769_p3), [#allocation2], %s1685_s15 }
  0x4f   : > { %2608 = dma.done.wait (%p2849_p12), %s547_s16, 128  }
  0x50   : > { %2610 = vsyncadd (%p2849_p12), %s547_s16, 4294967168 }
  0x51   : > { %2612 = dma.done.wait (%p56_p1), [#allocation6], 2080  }
  0x52   : > { %2614 = vsyncadd (%p56_p1), [#allocation6], 4294965216 }
  0x53   : > { %2616 = dma.done.wait (%p56_p1), [#allocation9], 6144  }
  0x54   : > { %2618 = vsyncadd (%p56_p1), [#allocation9], 4294961152 }
  0x55   : > { %2620 = dma.done.wait (%p56_p1), [#allocation12], 2064  }
  0x56   : > { %2622 = vsyncadd (%p56_p1), [#allocation12], 4294965232 }
  0x57   : > { %2624 = dma.done.wait (%p56_p1), [#allocation15], 1040  }
  0x58   : > { %2626 = vsyncadd (%p56_p1), [#allocation15], 4294966256  ;;  %v2913_v0 = vld [vmem:[%s550_s7] sm:$0xff]  ;;  %v2659_v1 = vmov 128.0   ;;  %v1745_v18 = vld [vmem:[#allocation5 + $0x60] sm:$0xf] }
  0x59   : > { %641 = vadd.xlane.f32.xlu0 %v2913_v0  ;;  %2277 = vrcp.f32 %v2659_v1  ;;  %v1753_v2 = vld [vmem:[#allocation5 + $0x70] sm:$0xf]  ;;  %v2066_v3 = vld [vmem:[#allocation5 + $0x74] sm:$0xf0]  ;;  %v2065_v4 = vld [vmem:[#allocation5 + $0x74] sm:$0xf] }
  0x5a   : > { %v1754_v5 = vor.u32 %v2066_v3, %v1753_v2  ;;  %v1755_v6 = vld [vmem:[#allocation5 + $0x78] sm:$0xf0]  ;;  %v2064_v19 = vld [vmem:[#allocation5 + $0x64] sm:$0xf0]  ;;  %v2063_v20 = vld [vmem:[#allocation5 + $0x64] sm:$0xf] }
  0x5b   : > { %v1758_v7 = vor.u32 %v2065_v4, %v1755_v6  ;;  %v1746_v21 = vor.u32 %v2064_v19, %v1745_v18  ;;  %v1747_v22 = vld [vmem:[#allocation5 + $0x68] sm:$0xf0]  ;;  %v1737_v24 = vld [vmem:[#allocation5 + $0x50] sm:$0xf]  ;;  %v2062_v25 = vld [vmem:[#allocation5 + $0x54] sm:$0xf0] }
  0x5c   : > { %779 = vmatpush.bf16.msra.mxu0 %v1754_v5  ;;  %v1750_v23 = vor.u32 %v2063_v20, %v1747_v22  ;;  %v2061_v26 = vld [vmem:[#allocation5 + $0x54] sm:$0xf]  ;;  %v1738_v27 = vor.u32 %v2062_v25, %v1737_v24  ;;  %v1739_v28 = vld [vmem:[#allocation5 + $0x58] sm:$0xf0]  ;;  %v1729_v30 = vld [vmem:[#allocation5 + $0x40] sm:$0xf] }
  0x5d   : > { %792 = vmatpush.bf16.msra.mxu1 %v1758_v7  ;;  %v1742_v29 = vor.u32 %v2061_v26, %v1739_v28  ;;  %v2060_v31 = vld [vmem:[#allocation5 + $0x44] sm:$0xf0]  ;;  %v2059_v32 = vld [vmem:[#allocation5 + $0x44] sm:$0xf]  ;;  %v1731_v34 = vld [vmem:[#allocation5 + $0x48] sm:$0xf0] }
  0x5e   : > { %v1730_v33 = vor.u32 %v2060_v31, %v1729_v30  ;;  %v1734_v35 = vor.u32 %v2059_v32, %v1731_v34  ;;  %v1721_v36 = vld [vmem:[#allocation5 + $0x30] sm:$0xf]  ;;  %v2058_v37 = vld [vmem:[#allocation5 + $0x34] sm:$0xf0]  ;;  %v2057_v38 = vld [vmem:[#allocation5 + $0x34] sm:$0xf] }
  0x5f   : > { %v2278_v8 = vpop.eup %2277  ;;  %v1722_v39 = vor.u32 %v2058_v37, %v1721_v36  ;;  %v1723_v40 = vld [vmem:[#allocation5 + $0x38] sm:$0xf0]  ;;  %v1713_v42 = vld [vmem:[#allocation5 + $0x20] sm:$0xf]  ;;  %v2056_v43 = vld [vmem:[#allocation5 + $0x24] sm:$0xf0] }
  0x60   : > { %v644_v9 = vmul.f32 128.0, %v2278_v8  ;;  %vm648_vm0 = vweird.f32 %v2278_v8  ;;  %780 = vmatpush.bf16.msra.mxu0 %v1746_v21  ;;  %v1726_v41 = vor.u32 %v2057_v38, %v1723_v40  ;;  %v2055_v44 = vld [vmem:[#allocation5 + $0x24] sm:$0xf]  ;;  %v1714_v45 = vor.u32 %v2056_v43, %v1713_v42  ;;  %v1715_v46 = vld [vmem:[#allocation5 + $0x28] sm:$0xf0]  ;;  %s3034_s29 = sld [smem:[#allocation29_spill]] }
  0x61   : > { %793 = vmatpush.bf16.msra.mxu1 %v1750_v23  ;;  %v1718_v47 = vor.u32 %v2055_v44, %v1715_v46  ;;  %v1705_v48 = vld [vmem:[#allocation5 + $0x10] sm:$0xf]  ;;  %v2054_v49 = vld [vmem:[#allocation5 + $0x14] sm:$0xf0]  ;;  %v2053_v50 = vld [vmem:[#allocation5 + $0x14] sm:$0xf] }
  0x62   : > { %v645_v10 = vsub.f32 1.0, %v644_v9  ;;  %v1706_v51 = vor.u32 %v2054_v49, %v1705_v48  ;;  %v1707_v52 = vld [vmem:[#allocation5 + $0x18] sm:$0xf0]  ;;  %v1697_v53 = vld [vmem:[#allocation5] sm:$0xf]  ;;  %s3035_s24 = sld [smem:[#allocation30_spill]] }
  0x63   : > { %v2052_v54 = vld [vmem:[#allocation5 + $0x4] sm:$0xf0]  ;;  %v1710_v55 = vor.u32 %v2053_v50, %v1707_v52  ;;  %v2051_v56 = vld [vmem:[#allocation5 + $0x4] sm:$0xf]  ;;  %v1699_v57 = vld [vmem:[#allocation5 + $0x8] sm:$0xf0] }
  0x64   : > { %v646_v11 = vmul.f32 %v2278_v8, %v645_v10  ;;  %781 = vmatpush.bf16.msra.mxu0 %v1738_v27  ;;  %v1698_v58 = vor.u32 %v2052_v54, %v1697_v53  ;;  %v1702_v59 = vor.u32 %v2051_v56, %v1699_v57  ;;  %v1817_v60 = vld [vmem:[#allocation8 + $0x70] sm:$0xf]  ;;  %v2082_v61 = vld [vmem:[#allocation8 + $0x74] sm:$0xf0]  ;;  %v2081_v3 = vld [vmem:[#allocation8 + $0x74] sm:$0xf] }
  0x65   : > { %794 = vmatpush.bf16.msra.mxu1 %v1742_v29  ;;  %v1881_v62 = vld [vmem:[#allocation8 + $0xf0] sm:$0xf]  ;;  %v1818_v1 = vor.u32 %v2082_v61, %v1817_v60  ;;  %v2098_v2 = vld [vmem:[#allocation8 + $0xf4] sm:$0xf0]  ;;  %v1819_v4 = vld [vmem:[#allocation8 + $0x78] sm:$0xf0] }
  0x66   : > { %v647_v12 = vadd.f32 %v2278_v8, %v646_v11  ;;  %v1882_v6 = vor.u32 %v2098_v2, %v1881_v62  ;;  %v1822_v7 = vor.u32 %v2081_v3, %v1819_v4  ;;  %v1883_v9 = vld [vmem:[#allocation8 + $0xf8] sm:$0xf0]  ;;  %v1809_v10 = vld [vmem:[#allocation8 + $0x60] sm:$0xf]  ;;  %v2079_v20 = vld [vmem:[#allocation8 + $0x64] sm:$0xf] }
  0x67   : > { %1023 = vmatpush.bf16.msra.mxu2 %v1818_v1  ;;  %v1811_v21 = vld [vmem:[#allocation8 + $0x68] sm:$0xf0]  ;;  %v2095_v23 = vld [vmem:[#allocation8 + $0xe4] sm:$0xf]  ;;  %v2078_v40 = vld [vmem:[#allocation8 + $0x54] sm:$0xf0] }
  0x68   : > { %v2916_v13 = vsel %vm648_vm0, %v2278_v8, %v647_v12  ;;  %782 = vmatpush.bf16.msra.mxu0 %v1730_v33  ;;  %v2097_v8 = vld [vmem:[#allocation8 + $0xf4] sm:$0xf]  ;;  %v2080_v12 = vld [vmem:[#allocation8 + $0x64] sm:$0xf0]  ;;  %1036 = vmatpush.bf16.msra.mxu3 %v1882_v6  ;;  %v1814_v22 = vor.u32 %v2079_v20, %v1811_v21  ;;  %v1875_v24 = vld [vmem:[#allocation8 + $0xe8] sm:$0xf0] }
  0x69   : > { %795 = vmatpush.bf16.msra.mxu1 %v1734_v35  ;;  %v1886_v11 = vor.u32 %v2097_v8, %v1883_v9  ;;  %v1810_v18 = vor.u32 %v2080_v12, %v1809_v10  ;;  %v1878_v25 = vor.u32 %v2095_v23, %v1875_v24  ;;  %v2271_v32 = vld [vmem:[%s2993_s1] ss:$0 sm:$0xff]  ;;  %v2094_v43 = vld [vmem:[#allocation8 + $0xd4] sm:$0xf0]  ;;  %v2077_v44 = vld [vmem:[#allocation8 + $0x54] sm:$0xf] }
  0x6a   : > { %v2272_v35 = vld [vmem:[%s2994_s2] ss:$0 sm:$0xff]  ;;  %v2093_v48 = vld [vmem:[#allocation8 + $0xd4] sm:$0xf]  ;;  %v1793_v49 = vld [vmem:[#allocation8 + $0x40] sm:$0xf] }
  0x6b   : > { %1024 = vmatpush.bf16.msra.mxu2 %v1810_v18  ;;  %v1857_v52 = vld [vmem:[#allocation8 + $0xc0] sm:$0xf]  ;;  %v2092_v53 = vld [vmem:[#allocation8 + $0xc4] sm:$0xf0]  ;;  %v2075_v56 = vld [vmem:[#allocation8 + $0x44] sm:$0xf] }
  0x6c   : > { %783 = vmatpush.bf16.msra.mxu0 %v1722_v39  ;;  %v1801_v39 = vld [vmem:[#allocation8 + $0x50] sm:$0xf]  ;;  %v1795_v57 = vld [vmem:[#allocation8 + $0x48] sm:$0xf0]  ;;  %v2090_v3 = vld [vmem:[#allocation8 + $0xb4] sm:$0xf0] }
  0x6d   : > { %796 = vmatpush.bf16.msra.mxu1 %v1726_v41  ;;  %v1865_v41 = vld [vmem:[#allocation8 + $0xd0] sm:$0xf]  ;;  %v1802_v42 = vor.u32 %v2078_v40, %v1801_v39  ;;  %v1859_v60 = vld [vmem:[#allocation8 + $0xc8] sm:$0xf0]  ;;  %v2073_v4 = vld [vmem:[#allocation8 + $0x34] sm:$0xf] }
  0x6e   : > { %v1866_v46 = vor.u32 %v2094_v43, %v1865_v41  ;;  %v1785_v62 = vld [vmem:[#allocation8 + $0x30] sm:$0xf]  ;;  %v2089_v8 = vld [vmem:[#allocation8 + $0xb4] sm:$0xf]  ;;  %v1851_v9 = vld [vmem:[#allocation8 + $0xb8] sm:$0xf0] }
  0x6f   : > { %1025 = vmatpush.bf16.msra.mxu2 %v1802_v42  ;;  %v1849_v1 = vld [vmem:[#allocation8 + $0xb0] sm:$0xf]  ;;  %v1777_v10 = vld [vmem:[#allocation8 + $0x20] sm:$0xf]  ;;  %v2072_v12 = vld [vmem:[#allocation8 + $0x24] sm:$0xf0] }
  0x70   : > { %784 = vmatpush.bf16.msra.mxu0 %v1714_v45  ;;  %v1803_v45 = vld [vmem:[#allocation8 + $0x58] sm:$0xf0]  ;;  %v1850_v6 = vor.u32 %v2090_v3, %v1849_v1  ;;  %v1779_v20 = vld [vmem:[#allocation8 + $0x28] sm:$0xf0]  ;;  %v2087_v21 = vld [vmem:[#allocation8 + $0xa4] sm:$0xf] }
  0x71   : > { %797 = vmatpush.bf16.msra.mxu1 %v1718_v47  ;;  %v1806_v47 = vor.u32 %v2077_v44, %v1803_v45  ;;  %v1843_v23 = vld [vmem:[#allocation8 + $0xa8] sm:$0xf0]  ;;  %v1769_v24 = vld [vmem:[#allocation8 + $0x10] sm:$0xf]  ;;  %v2084_v40 = vld [vmem:[#allocation8 + $0x84] sm:$0xf0] }
  0x72   : > { %v2067_v41 = vld [vmem:[#allocation8 + $0x4] sm:$0xf]  ;;  %v1763_v42 = vld [vmem:[#allocation8 + $0x8] sm:$0xf0]  ;;  %s3036_s4 = sld [smem:[#allocation32_spill]]  ;;  %s2048_s11 = sshll.u32 %s2764_s25, 3 }
  0x73   : > { %v2083_v43 = vld [vmem:[#allocation8 + $0x84] sm:$0xf]  ;;  %v1827_v44 = vld [vmem:[#allocation8 + $0x88] sm:$0xf0]  ;;  %s3037_s8 = sld [smem:[#allocation33_spill]]  ;;  %s637_s3 = scalar_lea.vmem [#allocation17], %s1685_s15 }
  0x74   : > { %785 = vmatpush.bf16.msra.mxu0 %v1706_v51  ;;  %v2076_v51 = vld [vmem:[#allocation8 + $0x44] sm:$0xf0]  ;;  %s1522_s9 = sshll.u32 %s637_s3, 4  ;;  %s1510_s22 = scalar_lea.sflag [#allocation4], %s2887_s23  ;;  %s1523_s9 = int_to_ptr.vmem [resolvable:$true] %s1522_s9 }
  0x75   : > { %798 = vmatpush.bf16.msra.mxu1 %v1710_v55  ;;  %v1794_v54 = vor.u32 %v2076_v51, %v1793_v49  ;;  %v1858_v55 = vor.u32 %v2092_v53, %v1857_v52  ;;  %v2114_v49 = vld [vmem:[#allocation10 + $0x78] sm:$0xff] }
  0x77   : > { %1026 = vmatpush.bf16.msra.mxu2 %v1794_v54 }
  0x78   : > { %786 = vmatpush.bf16.msra.mxu0 %v1698_v58  ;;  %v2091_v58 = vld [vmem:[#allocation8 + $0xc4] sm:$0xf] }
  0x79   : > { %799 = vmatpush.bf16.msra.mxu1 %v1702_v59  ;;  %v1798_v59 = vor.u32 %v2075_v56, %v1795_v57  ;;  %v1862_v61 = vor.u32 %v2091_v58, %v1859_v60  ;;  %s1520_s30 = scalar_lea.hbm %s3037_s8, %s2048_s11  ;;  %s2583_s15 = scalar_lea.hbm %s3037_s8, 16 }
  0x7c   : > { %1049 = vmatpush.bf16.msrb.mxu0 %v1822_v7 }
  0x7d   : > { %1062 = vmatpush.bf16.msrb.mxu1 %v1886_v11  ;;  %v1854_v11 = vor.u32 %v2089_v8, %v1851_v9 }
  0x80   : > { %1050 = vmatpush.bf16.msrb.mxu0 %v1814_v22 }
  0x81   : > { %1063 = vmatpush.bf16.msrb.mxu1 %v1878_v25  ;;  %v2070_v25 = vld [vmem:[#allocation8 + $0x14] sm:$0xf0] }
  0x84   : > { %1051 = vmatpush.bf16.msrb.mxu0 %v1806_v47  ;;  %v1766_v47 = vor.u32 %v2067_v41, %v1763_v42 }
  0x88   : > { %1052 = vmatpush.bf16.msrb.mxu0 %v1798_v59 }
  0xcc   : > { %v642_v14 = vpop.xlane.xlu0 %641 }
  0xcd   : > { %v650_v15 = vmul.f32 %v2916_v13, %v642_v14  ;;  %v1873_v14 = vld [vmem:[#allocation8 + $0xe0] sm:$0xf] }
  0xcf   : > { %v2920_v16 = vsub.f32 %v2913_v0, %v650_v15  ;;  %v2096_v15 = vld [vmem:[#allocation8 + $0xe4] sm:$0xf0] }
  0xd0   : > { %v1874_v19 = vor.u32 %v2096_v15, %v1873_v14  ;;  %v1841_v14 = vld [vmem:[#allocation8 + $0xa0] sm:$0xf]  ;;  %v2088_v15 = vld [vmem:[#allocation8 + $0xa4] sm:$0xf0] }
  0xd1   : > { %v652_v17 = vmul.f32 %v2920_v16, %v2920_v16  ;;  %v1842_v18 = vor.u32 %v2088_v15, %v1841_v14 }
  0xd2   : > { %1037 = vmatpush.bf16.msra.mxu3 %v1874_v19  ;;  %v2071_v19 = vld [vmem:[#allocation8 + $0x24] sm:$0xf] }
  0xd3   : > { %653 = vadd.xlane.f32.xlu0 %v652_v17  ;;  %v1782_v22 = vor.u32 %v2071_v19, %v1779_v20  ;;  %v2112_v19 = vld [vmem:[#allocation10 + $0x68] sm:$0xff]  ;;  %v2105_v20 = vld [vmem:[#allocation10 + $0x30] sm:$0xff] }
  0xd6   : > { %1038 = vmatpush.bf16.msra.mxu3 %v1866_v46 }
  0xda   : > { %1039 = vmatpush.bf16.msra.mxu3 %v1858_v55 }
  0xde   : > { %1040 = vmatpush.bf16.msra.mxu3 %v1850_v6 }
  0xe2   : > { %1041 = vmatpush.bf16.msra.mxu3 %v1842_v18  ;;  %v2106_v18 = vld [vmem:[#allocation10 + $0x38] sm:$0xff] }
 0x146   : > { %v654_v63 = vpop.xlane.xlu0 %653 }
 0x147   : > { %v655_v5 = vmul.f32 %v654_v63, %v2916_v13  ;;  %v2074_v63 = vld [vmem:[#allocation8 + $0x34] sm:$0xf0] }
 0x148   : > { %v1786_v2 = vor.u32 %v2074_v63, %v1785_v62 }
 0x149   : > { %v656_v17 = vadd.f32 1e-05, %v655_v5  ;;  %v1787_v5 = vld [vmem:[#allocation8 + $0x38] sm:$0xf0] }
 0x14a   : > { %v1790_v7 = vor.u32 %v2073_v4, %v1787_v5  ;;  %1027 = vmatpush.bf16.msra.mxu2 %v1786_v2 }
 0x14b   : > { %2279 = vrsqrt.f32 %v656_v17  ;;  %vm663_vm2 = vweird.f32 %v656_v17 }
 0x14c   : > { %1053 = vmatpush.bf16.msrb.mxu0 %v1790_v7 }
 0x150   : > { %1054 = vmatpush.bf16.msrb.mxu0 %v1782_v22  ;;  %v2104_v22 = vld [vmem:[#allocation10 + $0x28] sm:$0xff] }
 0x151   : > { %v2280_v26 = vpop.eup %2279 }
 0x152   : > { %v658_v27 = vmul.f32 %v2280_v26, %v656_v17  ;;  %vm664_vm1 = vweird.f32 %v2280_v26  ;;  %v1778_v17 = vor.u32 %v2072_v12, %v1777_v10 }
 0x153   : > { %vm665_vm3 = vmor %vm663_vm2, %vm664_vm1 }
 0x154   : > { %v659_v28 = vmul.f32 %v2280_v26, %v658_v27  ;;  %v1833_v27 = vld [vmem:[#allocation8 + $0x90] sm:$0xf]  ;;  %1028 = vmatpush.bf16.msra.mxu2 %v1778_v17 }
 0x155   : > { %v2113_v17 = vld [vmem:[#allocation10 + $0x70] sm:$0xff] }
 0x156   : > { %v660_v29 = vmul.f32 0.5, %v659_v28  ;;  %v2086_v28 = vld [vmem:[#allocation8 + $0x94] sm:$0xf0] }
 0x158   : > { %v661_v30 = vsub.f32 1.5, %v660_v29  ;;  %v2069_v29 = vld [vmem:[#allocation8 + $0x14] sm:$0xf] }
 0x15a   : > { %v662_v31 = vmul.f32 %v2280_v26, %v661_v30  ;;  %v1770_v30 = vor.u32 %v2070_v25, %v1769_v24  ;;  %v2103_v24 = vld [vmem:[#allocation10 + $0x20] sm:$0xff]  ;;  %v2109_v25 = vld [vmem:[#allocation10 + $0x50] sm:$0xff] }
 0x15c   : > { %v666_v33 = vsel %vm665_vm3, %v2280_v26, %v662_v31  ;;  %v1846_v26 = vor.u32 %v2087_v21, %v1843_v23  ;;  %v1771_v31 = vld [vmem:[#allocation8 + $0x18] sm:$0xf0]  ;;  %1029 = vmatpush.bf16.msra.mxu2 %v1770_v30  ;;  %v2111_v21 = vld [vmem:[#allocation10 + $0x60] sm:$0xff]  ;;  %v2100_v30 = vld [vmem:[#allocation10 + $0x8] sm:$0xff] }
 0x15d   : > { %v667_v34 = vmul.f32 %v666_v33, %v2920_v16  ;;  %v1867_v16 = vld [vmem:[#allocation8 + $0xd8] sm:$0xf0] }
 0x15e   : > { %v1870_v50 = vor.u32 %v2093_v48, %v1867_v16  ;;  %v1835_v33 = vld [vmem:[#allocation8 + $0x98] sm:$0xf0]  ;;  %v1830_v48 = vor.u32 %v2083_v43, %v1827_v44 }
 0x15f   : > { %v671_v36 = vmul.f32 %v2271_v32, %v667_v34  ;;  %v2085_v32 = vld [vmem:[#allocation8 + $0x94] sm:$0xf]  ;;  %v1834_v34 = vor.u32 %v2086_v28, %v1833_v27  ;;  %v693_v16 = vld [vmem:[#allocation7] sm:$0x3]  ;;  %v2108_v27 = vld [vmem:[#allocation10 + $0x48] sm:$0xff] }
 0x160   : > { %1064 = vmatpush.bf16.msrb.mxu1 %v1870_v50  ;;  %v1838_v39 = vor.u32 %v2085_v32, %v1835_v33  ;;  %v695_v50 = vperm.slane %v693_v16, 0  ;;  %v696_v51 = vperm.slane %v693_v16, 1  ;;  %v2110_v23 = vld [vmem:[#allocation10 + $0x58] sm:$0xff]  ;;  %v2101_v28 = vld [vmem:[#allocation10 + $0x10] sm:$0xff]  ;;  %v2099_v32 = vld [vmem:[#allocation10] sm:$0xff] }
 0x161   : > { %v675_v37 = vadd.f32 %v2272_v35, %v671_v36  ;;  %v1774_v35 = vor.u32 %v2069_v29, %v1771_v31  ;;  %v1761_v36 = vld [vmem:[#allocation8] sm:$0xf]  ;;  %1042 = vmatpush.bf16.msra.mxu3 %v1834_v34  ;;  %v857_v31 = vld [vmem:[%s2998_s6] sm:$0x3] }
 0x162   : > { %v2107_v29 = vld [vmem:[#allocation10 + $0x40] sm:$0xff]  ;;  %v860_v33 = vperm.slane %v857_v31, 1 }
 0x163   : > { %v692_v38 = vpack.c.bf16 %v675_v37, %v675_v37  ;;  %v2068_v37 = vld [vmem:[#allocation8 + $0x4] sm:$0xf0]  ;;  %1055 = vmatpush.bf16.msrb.mxu0 %v1774_v35 }
 0x164   : > { %1065 = vmatpush.bf16.msrb.mxu1 %v1862_v61  ;;  %v1762_v45 = vor.u32 %v2068_v37, %v1761_v36 }
 0x165   : > { %787 = vmatmul.bf16.vlgmr.msra.gmra.mxu0 %v692_v38  ;;  %800 = vmatmul.bf16.vlgmr.msra.gmra.mxu1 %v692_v38  ;;  %v1825_v38 = vld [vmem:[#allocation8 + $0x80] sm:$0xf] }
 0x166   : > { %v1826_v46 = vor.u32 %v2084_v40, %v1825_v38  ;;  %1030 = vmatpush.bf16.msra.mxu2 %v1762_v45  ;;  %v859_v38 = vperm.slane %v857_v31, 0 }
 0x167   : > { %1056 = vmatpush.bf16.msrb.mxu0 %v1766_v47 }
 0x168   : > { %1066 = vmatpush.bf16.msrb.mxu1 %v1854_v11  ;;  %1043 = vmatpush.bf16.msra.mxu3 %v1826_v46 }
 0x16a   : > { %1223 = vmatpush.bf16.msrb.mxu2 %v2106_v18 }
 0x16c   : > { %1067 = vmatpush.bf16.msrb.mxu1 %v1846_v26  ;;  %1236 = vmatpush.bf16.msrb.mxu3 %v2114_v49  ;;  %v2102_v26 = vld [vmem:[#allocation10 + $0x18] sm:$0xff] }
 0x16e   : > { %1224 = vmatpush.bf16.msrb.mxu2 %v2105_v20 }
 0x170   : > { %1068 = vmatpush.bf16.msrb.mxu1 %v1838_v39  ;;  %1237 = vmatpush.bf16.msrb.mxu3 %v2113_v17  ;;  %v2011_v17 = vld [vmem:[#allocation13 + $0x78] sm:$0xf0] }
 0x172   : > { %1225 = vmatpush.bf16.msrb.mxu2 %v2104_v22  ;;  %v2001_v22 = vld [vmem:[#allocation13 + $0x60] sm:$0xf] }
 0x174   : > { %1069 = vmatpush.bf16.msrb.mxu1 %v1830_v48  ;;  %1238 = vmatpush.bf16.msrb.mxu3 %v2112_v19 }
 0x176   : > { %1226 = vmatpush.bf16.msrb.mxu2 %v2103_v24  ;;  %v2127_v24 = vld [vmem:[#allocation13 + $0x64] sm:$0xf] }
 0x178   : > { %1239 = vmatpush.bf16.msrb.mxu3 %v2111_v21 }
 0x17a   : > { %1227 = vmatpush.bf16.msrb.mxu2 %v2102_v26  ;;  %v2003_v26 = vld [vmem:[#allocation13 + $0x68] sm:$0xf0] }
 0x17c   : > { %1240 = vmatpush.bf16.msrb.mxu3 %v2110_v23  ;;  %v2128_v23 = vld [vmem:[#allocation13 + $0x64] sm:$0xf0] }
 0x17e   : > { %1228 = vmatpush.bf16.msrb.mxu2 %v2101_v28  ;;  %v1993_v28 = vld [vmem:[#allocation13 + $0x50] sm:$0xf] }
 0x180   : > { %1241 = vmatpush.bf16.msrb.mxu3 %v2109_v25  ;;  %v2002_v25 = vor.u32 %v2128_v23, %v2001_v22  ;;  %v2134_v22 = vld [vmem:[#allocation14 + $0x18] sm:$0xff]  ;;  %v2133_v23 = vld [vmem:[#allocation14 + $0x10] sm:$0xff] }
 0x182   : > { %1229 = vmatpush.bf16.msrb.mxu2 %v2100_v30  ;;  %v2125_v30 = vld [vmem:[#allocation13 + $0x54] sm:$0xf] }
 0x184   : > { %1242 = vmatpush.bf16.msrb.mxu3 %v2108_v27  ;;  %v2006_v27 = vor.u32 %v2127_v24, %v2003_v26  ;;  %v2131_v24 = vld [vmem:[#allocation14] sm:$0xff] }
 0x186   : > { %1230 = vmatpush.bf16.msrb.mxu2 %v2099_v32  ;;  %v1995_v32 = vld [vmem:[#allocation13 + $0x58] sm:$0xf0] }
 0x188   : > { %1243 = vmatpush.bf16.msrb.mxu3 %v2107_v29  ;;  %v2126_v29 = vld [vmem:[#allocation13 + $0x54] sm:$0xf0] }
 0x189   : > { %v1994_v31 = vor.u32 %v2126_v29, %v1993_v28 }
 0x1e2   : > { %v788_v52 = vpop.f32.mrf.mxu0  ;;  %v801_v53 = vpop.f32.mrf.mxu1 }
 0x1e3   : > { %v789_v54 = vadd.f32 %v788_v52, %v695_v50  ;;  %v802_v55 = vadd.f32 %v801_v53, %v696_v51 }
 0x1e5   : > { %v807_v56 = vmul.f32 0.044715, %v789_v54  ;;  %v808_v57 = vmul.f32 0.044715, %v802_v55  ;;  %v805_v7 = vmul.f32 0.5, %v789_v54  ;;  %v806_v9 = vmul.f32 0.5, %v802_v55 }
 0x1e7   : > { %v809_v58 = vmul.f32 %v807_v56, %v789_v54  ;;  %v810_v59 = vmul.f32 %v808_v57, %v802_v55 }
 0x1e9   : > { %v811_v60 = vmul.f32 %v809_v58, %v789_v54  ;;  %v812_v61 = vmul.f32 %v810_v59, %v802_v55 }
 0x1ea   : > { %v790_v62 = vpop.f32.mrf.mxu0  ;;  %v803_v63 = vpop.f32.mrf.mxu1 }
 0x1eb   : > { %v813_v1 = vadd.f32 %v811_v60, %v789_v54  ;;  %v814_v2 = vadd.f32 %v812_v61, %v802_v55 }
 0x1ed   : > { %v815_v3 = vmul.f32 0.7978846, %v813_v1  ;;  %v816_v4 = vmul.f32 0.7978846, %v814_v2 }
 0x1ef   : > { %2281 = vtanh.f32 %v815_v3 }
 0x1f0   : > { %2283 = vtanh.f32 %v816_v4 }
 0x1f5   : > { %v2282_v5 = vpop.eup %2281 }
 0x1f6   : > { %v2284_v6 = vpop.eup %2283  ;;  %v819_v8 = vadd.f32 1.0, %v2282_v5 }
 0x1f7   : > { %v820_v10 = vadd.f32 1.0, %v2284_v6  ;;  %v2273_v6 = vld [vmem:[#allocation11] ss:$0 sm:$0xff] }
 0x1f8   : > { %v821_v11 = vmul.f32 %v819_v8, %v805_v7 }
 0x1f9   : > { %v822_v12 = vmul.f32 %v820_v10, %v806_v9 }
 0x1fa   : > { %v823_v14 = vpack.c.bf16 %v821_v11, %v821_v11  ;;  %v2009_v11 = vld [vmem:[#allocation13 + $0x70] sm:$0xf] }
 0x1fb   : > { %v824_v15 = vpack.c.bf16 %v822_v12, %v822_v12  ;;  %v2130_v12 = vld [vmem:[#allocation13 + $0x74] sm:$0xf0] }
 0x1fc   : > { %1031 = vmatmul.bf16.vlgmr.msra.gmra.mxu2 %v823_v14  ;;  %1057 = vmatmul.bf16.vlgmr.msrb.gmra.mxu0 %v823_v14  ;;  %v2129_v14 = vld [vmem:[#allocation13 + $0x74] sm:$0xf] }
 0x1fd   : > { %1044 = vmatmul.bf16.vlgmr.msra.gmra.mxu3 %v824_v15  ;;  %1070 = vmatmul.bf16.vlgmr.msrb.gmra.mxu1 %v824_v15  ;;  %v2010_v15 = vor.u32 %v2130_v12, %v2009_v11  ;;  %v2014_v18 = vor.u32 %v2129_v14, %v2011_v17  ;;  %v2274_v11 = vld [vmem:[%s3034_s29] ss:$0 sm:$0xff]  ;;  %s1524_s29 = sshll.u32 %s1520_s30, 4  ;;  %s1525_s29 = int_to_ptr.hbm [resolvable:$true] %s1524_s29 }
 0x1fe   : > { %s2577_s27 = sshra.s32 %s1525_s29, 4  ;;  %s2578_s27 = int_to_ptr.hbm [resolvable:$true] %s2577_s27 }
 0x1ff   : > { %1388 = vmatpush.bf16.msra.mxu0 %v2010_v15  ;;  %1401 = vmatpush.bf16.msra.mxu1 %v2014_v18  ;;  %s2579_s25 = scalar_lea.hbm %s2578_s27, 8  ;;  %p2584_p12 = scmp.lt.s32.totalorder %s2578_s27, %s3037_s8 }
 0x200   : > { %p2580_p1 = scmp.ne.s32.totalorder %s2578_s27, %s2579_s25  ;;  %p2585_p7 = scmp.lt.s32.totalorder %s2583_s15, %s2579_s25 }
 0x202   : > { %p2581_p3 = pnand %p2580_p1, %p2856_p4  ;;  %p2586_p8 = por %p2585_p7, %p2584_p12 }
 0x203   : > { %1389 = vmatpush.bf16.msra.mxu0 %v2002_v25  ;;  %1402 = vmatpush.bf16.msra.mxu1 %v2006_v27  ;;  %v1302_v25 = vld [vmem:[%s3036_s4] sm:$0x3] }
 0x204   : > { %v1305_v26 = vperm.slane %v1302_v25, 1  ;;  %p2582_p5 = pneg %p2581_p3 }
 0x206   : > { %p2587_p9 = pnand %p2586_p8, %p2582_p5 }
 0x207   : > { %1390 = vmatpush.bf16.msra.mxu0 %v1994_v31 }
 0x279   : > { %v1058_v34 = vpop.f32.mrf.mxu0 }
 0x27a   : > { %v1059_v35 = vadd.f32 %v1058_v34, %v860_v33  ;;  %v1071_v36 = vpop.f32.mrf.mxu1  ;;  %v1998_v33 = vor.u32 %v2125_v30, %v1995_v32  ;;  %v1985_v34 = vld [vmem:[#allocation13 + $0x40] sm:$0xf] }
 0x27c   : > { %v1072_v37 = vadd.f32 %v1071_v36, %v1059_v35  ;;  %1403 = vmatpush.bf16.msra.mxu1 %v1998_v33  ;;  %v2124_v35 = vld [vmem:[#allocation13 + $0x44] sm:$0xf0]  ;;  %v2123_v36 = vld [vmem:[#allocation13 + $0x44] sm:$0xf] }
 0x27e   : > { %v1078_v39 = vmul.f32 0.044715, %v1072_v37  ;;  %v1076_v57 = vmul.f32 0.5, %v1072_v37 }
 0x27f   : > { %v1032_v40 = vpop.f32.mrf.mxu2 }
 0x280   : > { %v1080_v41 = vmul.f32 %v1078_v39, %v1072_v37  ;;  %v1033_v42 = vadd.f32 %v1032_v40, %v859_v38  ;;  %v1045_v43 = vpop.f32.mrf.mxu3  ;;  %v1987_v38 = vld [vmem:[#allocation13 + $0x48] sm:$0xf0]  ;;  %v1977_v40 = vld [vmem:[#allocation13 + $0x30] sm:$0xf] }
 0x281   : > { %v1060_v44 = vpop.f32.mrf.mxu0  ;;  %v1990_v39 = vor.u32 %v2123_v36, %v1987_v38 }
 0x282   : > { %v1046_v45 = vadd.f32 %v1045_v43, %v1033_v42  ;;  %v1073_v46 = vpop.f32.mrf.mxu1  ;;  %v1082_v47 = vmul.f32 %v1080_v41, %v1072_v37  ;;  %v2122_v41 = vld [vmem:[#allocation13 + $0x34] sm:$0xf0]  ;;  %v2121_v42 = vld [vmem:[#allocation13 + $0x34] sm:$0xf]  ;;  %v1979_v44 = vld [vmem:[#allocation13 + $0x38] sm:$0xf0] }
 0x283   : > { %1404 = vmatpush.bf16.msra.mxu1 %v1990_v39  ;;  %v1978_v43 = vor.u32 %v2122_v41, %v1977_v40  ;;  %v1969_v46 = vld [vmem:[#allocation13 + $0x20] sm:$0xf] }
 0x284   : > { %v1077_v48 = vmul.f32 0.044715, %v1046_v45  ;;  %v1084_v16 = vadd.f32 %v1082_v47, %v1072_v37  ;;  %v1075_v62 = vmul.f32 0.5, %v1046_v45  ;;  %v1986_v37 = vor.u32 %v2124_v35, %v1985_v34  ;;  %v2120_v47 = vld [vmem:[#allocation13 + $0x24] sm:$0xf0] }
 0x286   : > { %v1079_v49 = vmul.f32 %v1077_v48, %v1046_v45  ;;  %v1086_v50 = vmul.f32 0.7978846, %v1084_v16  ;;  %1391 = vmatpush.bf16.msra.mxu0 %v1986_v37  ;;  %v2119_v48 = vld [vmem:[#allocation13 + $0x24] sm:$0xf]  ;;  %v1970_v16 = vor.u32 %v2120_v47, %v1969_v46  ;;  %v1304_v37 = vperm.slane %v1302_v25, 0 }
 0x287   : > { %v1034_v51 = vpop.f32.mrf.mxu2 }
 0x288   : > { %v1047_v52 = vpop.f32.mrf.mxu3  ;;  %2285 = vtanh.f32 %v1086_v50  ;;  %v1081_v53 = vmul.f32 %v1079_v49, %v1046_v45  ;;  %v1971_v49 = vld [vmem:[#allocation13 + $0x28] sm:$0xf0]  ;;  %v1961_v51 = vld [vmem:[#allocation13 + $0x10] sm:$0xf] }
 0x289   : > { %v1974_v50 = vor.u32 %v2119_v48, %v1971_v49  ;;  %v2118_v52 = vld [vmem:[#allocation13 + $0x14] sm:$0xf0] }
 0x28a   : > { %v1083_v54 = vadd.f32 %v1081_v53, %v1046_v45  ;;  %v1982_v45 = vor.u32 %v2121_v42, %v1979_v44  ;;  %1392 = vmatpush.bf16.msra.mxu0 %v1978_v43  ;;  %v2117_v53 = vld [vmem:[#allocation13 + $0x14] sm:$0xf] }
 0x28c   : > { %v1085_v55 = vmul.f32 0.7978846, %v1083_v54  ;;  %1405 = vmatpush.bf16.msra.mxu1 %v1982_v45  ;;  %v1962_v54 = vor.u32 %v2118_v52, %v1961_v51  ;;  %v2276_v45 = vld [vmem:[#allocation16] ss:$0 sm:$0xff] }
 0x28e   : > { %v2286_v56 = vpop.eup %2285  ;;  %2287 = vtanh.f32 %v1085_v55  ;;  %1393 = vmatpush.bf16.msra.mxu0 %v1970_v16  ;;  %v1963_v55 = vld [vmem:[#allocation13 + $0x18] sm:$0xf0] }
 0x28f   : > { %v1090_v58 = vadd.f32 1.0, %v2286_v56  ;;  %v1953_v56 = vld [vmem:[#allocation13] sm:$0xf] }
 0x290   : > { %1406 = vmatpush.bf16.msra.mxu1 %v1974_v50 }
 0x291   : > { %v1092_v59 = vmul.f32 %v1090_v58, %v1076_v57  ;;  %v2116_v57 = vld [vmem:[#allocation13 + $0x4] sm:$0xf0]  ;;  %v1966_v58 = vor.u32 %v2117_v53, %v1963_v55 }
 0x292   : > { %1394 = vmatpush.bf16.msra.mxu0 %v1962_v54 }
 0x293   : > { %v1094_v60 = vpack.c.bf16 %v1092_v59, %v1092_v59  ;;  %v2115_v59 = vld [vmem:[#allocation13 + $0x4] sm:$0xf] }
 0x294   : > { %v2288_v61 = vpop.eup %2287  ;;  %1407 = vmatpush.bf16.msra.mxu1 %v1966_v58 }
 0x295   : > { %1244 = vmatmul.bf16.vlgmr.msrb.gmra.mxu3 %v1094_v60  ;;  %v1089_v63 = vadd.f32 1.0, %v2288_v61  ;;  %v1955_v60 = vld [vmem:[#allocation13 + $0x8] sm:$0xf0]  ;;  %v1954_v61 = vor.u32 %v2116_v57, %v1953_v56 }
 0x297   : > { %v1091_v1 = vmul.f32 %v1089_v63, %v1075_v62  ;;  %v1958_v62 = vor.u32 %v2115_v59, %v1955_v60  ;;  %1395 = vmatpush.bf16.msra.mxu0 %v1954_v61  ;;  %v2138_v63 = vld [vmem:[#allocation14 + $0x38] sm:$0xff] }
 0x298   : > { %1489 = vmatpush.bf16.msra.mxu2 %v2138_v63 }
 0x299   : > { %v1093_v2 = vpack.c.bf16 %v1091_v1, %v1091_v1  ;;  %1408 = vmatpush.bf16.msra.mxu1 %v1958_v62 }
 0x29b   : > { %1231 = vmatmul.bf16.vlgmr.msrb.gmra.mxu2 %v1093_v2 }
 0x318   : > { %v1245_v3 = vpop.f32.mrf.mxu3 }
 0x31e   : > { %v1232_v4 = vpop.f32.mrf.mxu2 }
 0x31f   : > { %v1246_v5 = vadd.f32 %v1245_v3, %v1232_v4 }
 0x320   : > { %v1247_v7 = vpop.f32.mrf.mxu3 }
 0x321   : > { %v1249_v8 = vadd.f32 %v1246_v5, %v2913_v0 }
 0x323   : > { %v2936_v9 = vadd.f32 %v2273_v6, %v1249_v8 }
 0x325   : > { %1257 = vadd.xlane.f32.xlu1 %v2936_v9 }
 0x326   : > { %v1234_v10 = vpop.f32.mrf.mxu2 }
 0x398   : > { %v1258_v19 = vpop.xlane.xlu1 %1257 }
 0x399   : > { %v1259_v20 = vmul.f32 %v1258_v19, %v2916_v13  ;;  %v2137_v19 = vld [vmem:[#allocation14 + $0x30] sm:$0xff] }
 0x39a   : > { %1490 = vmatpush.bf16.msra.mxu2 %v2137_v19 }
 0x39b   : > { %v2941_v21 = vsub.f32 %v2936_v9, %v1259_v20  ;;  %v2136_v20 = vld [vmem:[#allocation14 + $0x28] sm:$0xff] }
 0x39d   : > { %v1261_v0 = vmul.f32 %v2941_v21, %v2941_v21 }
 0x39e   : > { %1491 = vmatpush.bf16.msra.mxu2 %v2136_v20 }
 0x39f   : > { %1262 = vadd.xlane.f32.xlu1 %v1261_v0  ;;  %v2135_v0 = vld [vmem:[#allocation14 + $0x20] sm:$0xff] }
 0x3a2   : > { %1492 = vmatpush.bf16.msra.mxu2 %v2135_v0 }
 0x3a6   : > { %1493 = vmatpush.bf16.msra.mxu2 %v2134_v22 }
 0x3aa   : > { %1494 = vmatpush.bf16.msra.mxu2 %v2133_v23 }
 0x412   : > { %v1263_v1 = vpop.xlane.xlu1 %1262 }
 0x413   : > { %v1264_v2 = vmul.f32 %v1263_v1, %v2916_v13  ;;  %v2275_v13 = vld [vmem:[%s3035_s24] ss:$0 sm:$0xff] }
 0x415   : > { %v1265_v3 = vadd.f32 1e-05, %v1264_v2 }
 0x417   : > { %2289 = vrsqrt.f32 %v1265_v3  ;;  %vm1272_vm5 = vweird.f32 %v1265_v3 }
 0x41d   : > { %v2290_v4 = vpop.eup %2289 }
 0x41e   : > { %v1267_v5 = vmul.f32 %v2290_v4, %v1265_v3  ;;  %vm1273_vm4 = vweird.f32 %v2290_v4 }
 0x41f   : > { %vm1274_vm6 = vmor %vm1272_vm5, %vm1273_vm4 }
 0x420   : > { %v1268_v6 = vmul.f32 %v2290_v4, %v1267_v5 }
 0x422   : > { %v1269_v7 = vmul.f32 0.5, %v1268_v6 }
 0x424   : > { %v1270_v8 = vsub.f32 1.5, %v1269_v7 }
 0x426   : > { %v1271_v10 = vmul.f32 %v2290_v4, %v1270_v8 }
 0x428   : > { %v1275_v12 = vsel %vm1274_vm6, %v2290_v4, %v1271_v10 }
 0x429   : > { %v1276_v14 = vmul.f32 %v1275_v12, %v2941_v21  ;;  %v2132_v21 = vld [vmem:[#allocation14 + $0x8] sm:$0xff] }
 0x42a   : > { %1495 = vmatpush.bf16.msra.mxu2 %v2132_v21 }
 0x42b   : > { %v1280_v15 = vmul.f32 %v2274_v11, %v1276_v14 }
 0x42d   : > { %v1284_v17 = vadd.f32 %v2275_v13, %v1280_v15 }
 0x42e   : > { %1496 = vmatpush.bf16.msra.mxu2 %v2131_v24 }
 0x42f   : > { %v1301_v18 = vpack.c.bf16 %v1284_v17, %v1284_v17 }
 0x431   : > { %1396 = vmatmul.bf16.vlgmr.msra.gmra.mxu0 %v1301_v18  ;;  %1409 = vmatmul.bf16.vlgmr.msra.gmra.mxu1 %v1301_v18 }
 0x4ae   : > { %v1397_v27 = vpop.f32.mrf.mxu0  ;;  %v1410_v28 = vpop.f32.mrf.mxu1 }
 0x4af   : > { %v1411_v29 = vadd.f32 %v1410_v28, %v1305_v26  ;;  %v1398_v41 = vadd.f32 %v1397_v27, %v1304_v37 }
 0x4b1   : > { %v1415_v30 = vmul.f32 0.044715, %v1411_v29  ;;  %v1414_v39 = vmul.f32 0.5, %v1411_v29 }
 0x4b3   : > { %v1416_v31 = vmul.f32 %v1415_v30, %v1411_v29 }
 0x4b5   : > { %v1417_v32 = vmul.f32 %v1416_v31, %v1411_v29 }
 0x4b6   : > { %v1399_v33 = vpop.f32.mrf.mxu0  ;;  %v1412_v34 = vpop.f32.mrf.mxu1 }
 0x4b7   : > { %v1418_v35 = vadd.f32 %v1417_v32, %v1411_v29 }
 0x4b9   : > { %v1419_v36 = vmul.f32 0.7978846, %v1418_v35 }
 0x4bb   : > { %2291 = vtanh.f32 %v1419_v36 }
 0x4c1   : > { %v2292_v38 = vpop.eup %2291 }
 0x4c2   : > { %v1421_v40 = vadd.f32 1.0, %v2292_v38 }
 0x4c4   : > { %v1422_v42 = vmul.f32 %v1421_v40, %v1414_v39 }
 0x4c6   : > { %v1423_v43 = vmul.f32 %v1422_v42, %v1398_v41 }
 0x4c8   : > { %v1424_v44 = vpack.c.bf16 %v1423_v43, %v1423_v43 }
 0x4ca   : > { %1497 = vmatmul.bf16.vlgmr.msra.gmra.mxu2 %v1424_v44 }
 0x54d   : > { %v1498_v46 = vpop.f32.mrf.mxu2 }
 0x54e   : > { %v1502_v47 = vadd.f32 %v1498_v46, %v2936_v9 }
 0x550   : > { %v1507_v48 = vadd.f32 %v2276_v45, %v1502_v47 }
 0x552   : > { %1508 = vst [vmem:[%s637_s3] sm:$0xff] %v1507_v48 }
 0x553   : > { %2590 = shalt.err (!%p2587_p9)
}
 0x554   : > { %2173 = dma.vmem_to_hbm [thread:$0]  (%p2856_p4), %s1523_s9, 128, %s1525_s29, %s1510_s22  }
 0x555   : > { %v1500_v9 = vpop.f32.mrf.mxu2 }
 0x556 PF: > { %s1536_s23 = sand.u32 1, %s2633_s18   ;;  %p3038_p10 = scmp.ge.s32.totalorder %s2645_s21, 2 }
 0x557   : > { %s1537_s11 = scalar_lea.sflag [#allocation4], %s1536_s23 }
 0x558   : > { %p2205_p13 = pnand %p3038_p10, %p2860_p6 }
 0x55a   : > { %p2206_p11 = pneg %p2205_p13 }
 0x55c   : > { %2628 = dma.done.wait (%p2206_p11), %s1537_s11, 128  }
 0x55d   : > { %2630 = vsyncadd (%p2206_p11), %s1537_s11, 4294967168  ;;  %p32_p0 = scmp.ge.s32.totalorder %s2830_s5, 4   ;;  %s3039_s18 = smov %s2637_s19 }
 0x55e   : > { %s3040_s19 = smov %s2641_s20  ;;  %s3041_s20 = smov %s2841_s10 }
 0x55f   : > { %s3042_s21 = smov %s2830_s5  ;;  %34 = sbr.rel (!%p32_p0) target bundleno = 20 (0x14), region = 157 }
 0x564   :  { %1543 = vsyncpa [#allocation3], 1 }
 0x565   :  { %1545 = vsyncpa [#allocation3 + $0x1], 1 }
 0x566   :  { %1546 = vsyncpa [#allocation6], 1 }
 0x567   :  { %1547 = vsyncpa [#allocation9], 1 }
 0x568   :  { %1548 = vsyncpa [#allocation12], 1 }
 0x569   :  { %1549 = vsyncpa [#allocation15], 1 }
 0x56a   :  { %1550 = vsyncpa [#allocation4], 1 }
 0x56b   :  { %1552 = vsyncpa [#allocation4 + $0x1], 1 }

// kernel: gpt2_mlp_multiple_residual.1
= control target key start
LH: loop header
LB: loop body
LE: loop exit
PB: predicated region body
PF: predicated region fallthrough
CT: control target
= control target key end

     0   :  { %s2992_s0 = inlined_call_operand.hbm [shape: f32[16,128], index: 0, kind: input, shape index: {}]   ;;  %s2993_s1 = inlined_call_operand.vmem [shape: f32[1,128], index: 1, kind: input, shape index: {}]   ;;  %s2994_s2 = inlined_call_operand.vmem [shape: f32[1,128], index: 2, kind: input, shape index: {}]   ;;  %s2995_s3 = inlined_call_operand.hbm [shape: bf16[128,256], index: 3, kind: input, shape index: {}]   ;;  %s2996_s4 = inlined_call_operand.hbm [shape: f32[1,256], index: 4, kind: input, shape index: {}]   ;;  %s2997_s5 = inlined_call_operand.hbm [shape: bf16[256,256], index: 5, kind: input, shape index: {}]   ;;  %s2998_s6 = inlined_call_operand.vmem [shape: f32[1,256], index: 6, kind: input, shape index: {}]   ;;  %s2999_s7 = inlined_call_operand.hbm [shape: bf16[256,128], index: 7, kind: input, shape index: {}]   ;;  %s3000_s8 = inlined_call_operand.hbm [shape: f32[1,128], index: 8, kind: input, shape index: {}]   ;;  %s3001_s9 = inlined_call_operand.vmem [shape: f32[1,128], index: 9, kind: input, shape index: {}]   ;;  %s3002_s10 = inlined_call_operand.vmem [shape: f32[1,128], index: 10, kind: input, shape index: {}]   ;;  %s3003_s11 = inlined_call_operand.hbm [shape: bf16[128,256], index: 11, kind: input, shape index: {}]   ;;  %s3004_s12 = inlined_call_operand.vmem [shape: f32[1,256], index: 12, kind: input, shape index: {}]   ;;  %s3005_s13 = inlined_call_operand.hbm [shape: bf16[128,128], index: 13, kind: input, shape index: {}]   ;;  %s3006_s14 = inlined_call_operand.hbm [shape: f32[1,128], index: 14, kind: input, shape index: {}]   ;;  %s3007_s15 = inlined_call_operand.hbm [shape: f32[16,128], index: 15, kind: output, shape index: {}]  }
   0x1   :  { %3010 = sst [smem:[#allocation24_spill]] %s2995_s3 }
   0x2   :  { %3011 = sst [smem:[#allocation25_spill]] %s2996_s4 }
   0x3   :  { %3012 = sst [smem:[#allocation26_spill]] %s2997_s5 }
   0x4   :  { %3013 = sst [smem:[#allocation27_spill]] %s2999_s7 }
   0x5   :  { %3014 = sst [smem:[#allocation28_spill]] %s3000_s8 }
   0x6   :  { %3015 = sst [smem:[#allocation29_spill]] %s3001_s9 }
   0x7   :  { %3016 = sst [smem:[#allocation30_spill]] %s3002_s10 }
   0x8   :  { %3017 = sst [smem:[#allocation31_spill]] %s3003_s11 }
   0x9   :  { %3018 = sst [smem:[#allocation32_spill]] %s3004_s12 }
   0xa   :  { %3019 = sst [smem:[#allocation33_spill]] %s3007_s15 }
   0xb   :  { %20 = vsyncpa [#allocation3], 0 }
   0xc   :  { %22 = vsyncpa [#allocation3 + $0x1], 0 }
   0xd   :  { %23 = vsyncpa [#allocation6], 0 }
   0xe   :  { %24 = vsyncpa [#allocation9], 0 }
   0xf   :  { %25 = vsyncpa [#allocation12], 0 }
  0x10   :  { %26 = vsyncpa [#allocation15], 0 }
  0x11   :  { %27 = vsyncpa [#allocation4], 0 }
  0x12   :  { %29 = vsyncpa [#allocation4 + $0x1], 0  ;;  %s2740_s18 = smov 0   ;;  %s2742_s19 = smov 0  }
  0x13   :  { %s2744_s20 = smov 0   ;;  %s2746_s21 = smov 0  }
  0x14 LB: > { %s3020_s3 = sld [smem:[#allocation24_spill]]  ;;  %s2764_s25 = sadd.s32 4294967295, %s2645_s21   ;;  %s2645_s21 = sphi %s2746_s21, %s3042_s21   ;;  %s2641_s20 = sphi %s2744_s20, %s3041_s20   ;;  %s2637_s19 = sphi %s2742_s19, %s3040_s19   ;;  %s2633_s18 = sphi %s2740_s18, %s3039_s18  }
  0x15   : > { %p1672_p0 = scmp.ge.s32.totalorder %s2645_s21, 1  ;;  %p56_p1 = scmp.eq.s32.totalorder %s2764_s25, 0 }
  0x16   : > { %p386_p2 = scmp.lt.s32.totalorder %s2645_s21, 3  ;;  %s2647_s27 = smov [#allocation5]  }
  0x17   : > { %s405_s28 = sshll.u32 %s2647_s27, 4  ;;  %s3022_s5 = sld [smem:[#allocation26_spill]]  ;;  %s406_s28 = int_to_ptr.vmem [resolvable:$true] %s405_s28 }
  0x18   : > { %p2769_p3 = pnand %p1672_p0, %p386_p2  ;;  %s3024_s8 = sld [smem:[#allocation28_spill]] }
  0x19   : > { %s3009_s12 = smov 128   ;;  %s2650_s10 = smov 8  }
  0x1a   : > { %s403_s24 = sshll.u32 %s3020_s3, 4  ;;  %p2175_p4 = pneg %p2769_p3  ;;  %s404_s24 = int_to_ptr.hbm [resolvable:$true] %s403_s24 }
  0x1b   : > { %s2648_s3 = smov [#allocation8]   ;;  %s2651_s29 = smov [#allocation11]  }
  0x1c   : > { %p2781_p6 = pnand %p2175_p4, %p56_p1  ;;  %s431_s15 = sshll.u32 %s2648_s3, 4  ;;  %s432_s15 = int_to_ptr.vmem [resolvable:$true] %s431_s15 }
  0x1d   : > { %s429_s16 = sshll.u32 %s3022_s5, 4  ;;  %s463_s30 = sshll.u32 %s2651_s29, 4  ;;  %s430_s16 = int_to_ptr.hbm [resolvable:$true] %s429_s16  ;;  %s464_s30 = int_to_ptr.vmem [resolvable:$true] %s463_s30 }
  0x1e   : > { %s461_s27 = sshll.u32 %s3024_s8, 4  ;;  %s495_s23 = sshll.u32 %s3005_s13, 4  ;;  %s462_s27 = int_to_ptr.hbm [resolvable:$true] %s461_s27  ;;  %s496_s23 = int_to_ptr.hbm [resolvable:$true] %s495_s23 }
  0x1f   : > { %2178 = dma.hbm_to_vmem [thread:$0]  (!%p2781_p6), %s404_s24, 2048, %s406_s28, [#allocation6], %s3009_s12, %s3009_s12, %s2650_s10  }
  0x20   : > { %2184 = dma.hbm_to_vmem [thread:$0]  (!%p2781_p6), %s430_s16, 4096, %s432_s15, [#allocation9], %s3009_s12, %s3009_s12, %s2650_s10  }
  0x21   : > { %2190 = dma.hbm_to_vmem [thread:$0]  (!%p2781_p6), %s462_s27, 16, %s464_s30, [#allocation12]  }
  0x22   : > { %s2652_s24 = smov [#allocation14]   ;;  %s3025_s4 = sld [smem:[#allocation25_spill]] }
  0x23   : > { %s497_s28 = sshll.u32 %s2652_s24, 4  ;;  %s2653_s15 = smov 64   ;;  %s498_s28 = int_to_ptr.vmem [resolvable:$true] %s497_s28 }
  0x24   : > { %s2654_s16 = smov 4   ;;  %s3026_s7 = sld [smem:[#allocation27_spill]] }
  0x25   : > { %2196 = dma.hbm_to_vmem [thread:$0]  (!%p2781_p6), %s496_s23, 1024, %s498_s28, [#allocation15], %s2653_s15, %s2653_s15, %s2654_s16  }
  0x26   : > { %s2655_s12 = smov [#allocation7]   ;;  %s2656_s5 = smov [#allocation10]  }
  0x27   : > { %s420_s27 = sshll.u32 %s2655_s12, 4  ;;  %s448_s8 = sshll.u32 %s2656_s5, 4  ;;  %s421_s27 = int_to_ptr.vmem [resolvable:$true] %s420_s27  ;;  %s449_s8 = int_to_ptr.vmem [resolvable:$true] %s448_s8 }
  0x28   : > { %s418_s9 = sshll.u32 %s3025_s4, 4  ;;  %s3027_s11 = sld [smem:[#allocation31_spill]]  ;;  %s419_s9 = int_to_ptr.hbm [resolvable:$true] %s418_s9 }
  0x29   : > { %2181 = dma.hbm_to_vmem [thread:$0]  (!%p2781_p6), %s419_s9, 32, %s421_s27, [#allocation6]  }
  0x2a   : > { %s446_s3 = sshll.u32 %s3026_s7, 4  ;;  %s510_s9 = sshll.u32 %s3006_s14, 4  ;;  %s447_s3 = int_to_ptr.hbm [resolvable:$true] %s446_s3  ;;  %s511_s9 = int_to_ptr.hbm [resolvable:$true] %s510_s9 }
  0x2b   : > { %2187 = dma.hbm_to_vmem [thread:$0]  (!%p2781_p6), %s447_s3, 2048, %s449_s8, [#allocation9], %s2653_s15, %s2653_s15, %s2654_s16  }
  0x2c   : > { %s2657_s29 = smov [#allocation13]   ;;  %s3028_s27 = smov 128  }
  0x2d   : > { %s480_s22 = sshll.u32 %s2657_s29, 4  ;;  %s2658_s15 = smov [#allocation16]   ;;  %s481_s22 = int_to_ptr.vmem [resolvable:$true] %s480_s22 }
  0x2e   : > { %s478_s23 = sshll.u32 %s3027_s11, 4  ;;  %s512_s16 = sshll.u32 %s2658_s15, 4  ;;  %s479_s23 = int_to_ptr.hbm [resolvable:$true] %s478_s23  ;;  %s513_s16 = int_to_ptr.vmem [resolvable:$true] %s512_s16 }
  0x2f   : > { %2193 = dma.hbm_to_vmem [thread:$0]  (!%p2781_p6), %s479_s23, 2048, %s481_s22, [#allocation12], %s3028_s27, %s3028_s27, %s2650_s10  }
  0x30   : > { %2199 = dma.hbm_to_vmem [thread:$0]  (!%p2781_p6), %s511_s9, 16, %s513_s16, [#allocation15]  }
  0x31   : > { %s1671_s3 = sadd.s32 4294967294, %s2645_s21   ;;  %s2830_s5 = sadd.s32 1, %s2645_s21  }
  0x32   : > { %s39_s8 = ssub.s32 %s2645_s21, %s2830_s5  ;;  %s42_s30 = sadd.s32 1, %s2641_s20 }
  0x33   : > { %p40_p7 = scmp.eq.s32.totalorder %s39_s8, 0  ;;  %p49_p8 = scmp.ne.s32.totalorder %s2641_s20, %s2637_s19 }
  0x34   : > { %p50_p9 = scmp.eq.s32.totalorder %s2645_s21, 0  ;;  %p55_p10 = scmp.ne.s32.totalorder %s2637_s19, %s2633_s18 }
  0x35   : > { %s2841_s10 = scalar_select %p40_p7, %s2641_s20, %s42_s30  }
  0x36   : > { %p2843_p11 = por %p50_p9, %p49_p8  ;;  %p2849_p12 = por %p56_p1, %p55_p10 }
  0x37   : > { %p373_p13 = scmp.eq.s32.totalorder %s2764_s25, 1  ;;  %p379_p0 = scmp.eq.s32.totalorder %s1671_s3, 1 }
  0x38   : > { %p2216_p2 = scmp.lt.s32.totalorder %s2645_s21, 2  ;;  %s523_s23 = sand.u32 1, %s2641_s20  }
  0x39   : > { %p2856_p4 = por %p373_p13, %p49_p8  ;;  %p2860_p6 = por %p379_p0, %p55_p10 }
  0x3a   : > { %s1682_s9 = sshll.u32 %s523_s23, 3  ;;  %s1683_s29 = sshll.u32 %s2645_s21, 3 }
  0x3b   : > { %s531_s15 = scalar_lea.hbm %s2992_s0, %s1683_s29  ;;  %s527_s16 = scalar_lea.vmem [#allocation2], %s1682_s9 }
  0x3c   : > { %s535_s8 = sshll.u32 %s527_s16, 4  ;;  %s533_s30 = sshll.u32 %s531_s15, 4  ;;  %s536_s8 = int_to_ptr.vmem [resolvable:$true] %s535_s8  ;;  %s534_s30 = int_to_ptr.hbm [resolvable:$true] %s533_s30 }
  0x3d   : > { %p2870_p7 = pnand %p2216_p2, %p2843_p11  ;;  %s524_s4 = scalar_lea.sflag [#allocation3], %s523_s23 }
  0x3e   : > { %s2533_s7 = sshra.s32 %s534_s30, 4  ;;  %s2540_s22 = scalar_lea.hbm %s2992_s0, 16  ;;  %s2534_s7 = int_to_ptr.hbm [resolvable:$true] %s2533_s7 }
  0x3f   : > { %s2535_s11 = scalar_lea.hbm %s2534_s7, 8  ;;  %p2537_p9 = pneg %p2870_p7 }
  0x40   : > { %p2536_p8 = scmp.ne.s32.totalorder %s2534_s7, %s2535_s11  ;;  %p2541_p11 = scmp.lt.s32.totalorder %s2534_s7, %s2992_s0 }
  0x41   : > { %p2542_p0 = scmp.lt.s32.totalorder %s2540_s22, %s2535_s11 }
  0x42   : > { %p2538_p10 = pnand %p2537_p9, %p2536_p8 }
  0x43   : > { %p2543_p2 = por %p2542_p0, %p2541_p11 }
  0x44   : > { %p2539_p13 = pneg %p2538_p10 }
  0x46   : > { %p2544_p5 = pnand %p2543_p2, %p2539_p13 }
  0x48   : > { %2547 = shalt.err (!%p2544_p5)
}
  0x49   : > { %2203 = dma.hbm_to_vmem [thread:$0]  (!%p2870_p7), %s534_s30, 128, %s536_s8, %s524_s4  }
  0x4a   : > { %544 = sbr.rel (%p2769_p3) target bundleno = 1366 (0x556), region = 80  ;;  %s2887_s23 = sand.u32 (!%p2769_p3), 1, %s2637_s19  }
  0x4b   : > { %s1685_s15 = sshll.u32 (!%p2769_p3), %s2887_s23, 3  ;;  %s547_s16 = scalar_lea.sflag (!%p2769_p3), [#allocation3], %s2887_s23 }
  0x4c   : > { %s550_s7 = scalar_lea.vmem (!%p2769_p3), [#allocation2], %s1685_s15 }
  0x4f   : > { %2608 = dma.done.wait (%p2849_p12), %s547_s16, 128  }
  0x50   : > { %2610 = vsyncadd (%p2849_p12), %s547_s16, 4294967168 }
  0x51   : > { %2612 = dma.done.wait (%p56_p1), [#allocation6], 2080  }
  0x52   : > { %2614 = vsyncadd (%p56_p1), [#allocation6], 4294965216 }
  0x53   : > { %2616 = dma.done.wait (%p56_p1), [#allocation9], 6144  }
  0x54   : > { %2618 = vsyncadd (%p56_p1), [#allocation9], 4294961152 }
  0x55   : > { %2620 = dma.done.wait (%p56_p1), [#allocation12], 2064  }
  0x56   : > { %2622 = vsyncadd (%p56_p1), [#allocation12], 4294965232 }
  0x57   : > { %2624 = dma.done.wait (%p56_p1), [#allocation15], 1040  }
  0x58   : > { %2626 = vsyncadd (%p56_p1), [#allocation15], 4294966256  ;;  %v2913_v0 = vld [vmem:[%s550_s7] sm:$0xff]  ;;  %v2659_v1 = vmov 128.0   ;;  %v1745_v18 = vld [vmem:[#allocation5 + $0x60] sm:$0xf] }
  0x59   : > { %641 = vadd.xlane.f32.xlu0 %v2913_v0  ;;  %2277 = vrcp.f32 %v2659_v1  ;;  %v1753_v2 = vld [vmem:[#allocation5 + $0x70] sm:$0xf]  ;;  %v2066_v3 = vld [vmem:[#allocation5 + $0x74] sm:$0xf0]  ;;  %v2065_v4 = vld [vmem:[#allocation5 + $0x74] sm:$0xf] }
  0x5a   : > { %v1754_v5 = vor.u32 %v2066_v3, %v1753_v2  ;;  %v1755_v6 = vld [vmem:[#allocation5 + $0x78] sm:$0xf0]  ;;  %v2064_v19 = vld [vmem:[#allocation5 + $0x64] sm:$0xf0]  ;;  %v2063_v20 = vld [vmem:[#allocation5 + $0x64] sm:$0xf] }
  0x5b   : > { %v1758_v7 = vor.u32 %v2065_v4, %v1755_v6  ;;  %v1746_v21 = vor.u32 %v2064_v19, %v1745_v18  ;;  %v1747_v22 = vld [vmem:[#allocation5 + $0x68] sm:$0xf0]  ;;  %v1737_v24 = vld [vmem:[#allocation5 + $0x50] sm:$0xf]  ;;  %v2062_v25 = vld [vmem:[#allocation5 + $0x54] sm:$0xf0] }
  0x5c   : > { %779 = vmatpush.bf16.msra.mxu0 %v1754_v5  ;;  %v1750_v23 = vor.u32 %v2063_v20, %v1747_v22  ;;  %v2061_v26 = vld [vmem:[#allocation5 + $0x54] sm:$0xf]  ;;  %v1738_v27 = vor.u32 %v2062_v25, %v1737_v24  ;;  %v1739_v28 = vld [vmem:[#allocation5 + $0x58] sm:$0xf0]  ;;  %v1729_v30 = vld [vmem:[#allocation5 + $0x40] sm:$0xf] }
  0x5d   : > { %792 = vmatpush.bf16.msra.mxu1 %v1758_v7  ;;  %v1742_v29 = vor.u32 %v2061_v26, %v1739_v28  ;;  %v2060_v31 = vld [vmem:[#allocation5 + $0x44] sm:$0xf0]  ;;  %v2059_v32 = vld [vmem:[#allocation5 + $0x44] sm:$0xf]  ;;  %v1731_v34 = vld [vmem:[#allocation5 + $0x48] sm:$0xf0] }
  0x5e   : > { %v1730_v33 = vor.u32 %v2060_v31, %v1729_v30  ;;  %v1734_v35 = vor.u32 %v2059_v32, %v1731_v34  ;;  %v1721_v36 = vld [vmem:[#allocation5 + $0x30] sm:$0xf]  ;;  %v2058_v37 = vld [vmem:[#allocation5 + $0x34] sm:$0xf0]  ;;  %v2057_v38 = vld [vmem:[#allocation5 + $0x34] sm:$0xf] }
  0x5f   : > { %v2278_v8 = vpop.eup %2277  ;;  %v1722_v39 = vor.u32 %v2058_v37, %v1721_v36  ;;  %v1723_v40 = vld [vmem:[#allocation5 + $0x38] sm:$0xf0]  ;;  %v1713_v42 = vld [vmem:[#allocation5 + $0x20] sm:$0xf]  ;;  %v2056_v43 = vld [vmem:[#allocation5 + $0x24] sm:$0xf0] }
  0x60   : > { %v644_v9 = vmul.f32 128.0, %v2278_v8  ;;  %vm648_vm0 = vweird.f32 %v2278_v8  ;;  %780 = vmatpush.bf16.msra.mxu0 %v1746_v21  ;;  %v1726_v41 = vor.u32 %v2057_v38, %v1723_v40  ;;  %v2055_v44 = vld [vmem:[#allocation5 + $0x24] sm:$0xf]  ;;  %v1714_v45 = vor.u32 %v2056_v43, %v1713_v42  ;;  %v1715_v46 = vld [vmem:[#allocation5 + $0x28] sm:$0xf0]  ;;  %s3034_s29 = sld [smem:[#allocation29_spill]] }
  0x61   : > { %793 = vmatpush.bf16.msra.mxu1 %v1750_v23  ;;  %v1718_v47 = vor.u32 %v2055_v44, %v1715_v46  ;;  %v1705_v48 = vld [vmem:[#allocation5 + $0x10] sm:$0xf]  ;;  %v2054_v49 = vld [vmem:[#allocation5 + $0x14] sm:$0xf0]  ;;  %v2053_v50 = vld [vmem:[#allocation5 + $0x14] sm:$0xf] }
  0x62   : > { %v645_v10 = vsub.f32 1.0, %v644_v9  ;;  %v1706_v51 = vor.u32 %v2054_v49, %v1705_v48  ;;  %v1707_v52 = vld [vmem:[#allocation5 + $0x18] sm:$0xf0]  ;;  %v1697_v53 = vld [vmem:[#allocation5] sm:$0xf]  ;;  %s3035_s24 = sld [smem:[#allocation30_spill]] }
  0x63   : > { %v2052_v54 = vld [vmem:[#allocation5 + $0x4] sm:$0xf0]  ;;  %v1710_v55 = vor.u32 %v2053_v50, %v1707_v52  ;;  %v2051_v56 = vld [vmem:[#allocation5 + $0x4] sm:$0xf]  ;;  %v1699_v57 = vld [vmem:[#allocation5 + $0x8] sm:$0xf0] }
  0x64   : > { %v646_v11 = vmul.f32 %v2278_v8, %v645_v10  ;;  %781 = vmatpush.bf16.msra.mxu0 %v1738_v27  ;;  %v1698_v58 = vor.u32 %v2052_v54, %v1697_v53  ;;  %v1702_v59 = vor.u32 %v2051_v56, %v1699_v57  ;;  %v1817_v60 = vld [vmem:[#allocation8 + $0x70] sm:$0xf]  ;;  %v2082_v61 = vld [vmem:[#allocation8 + $0x74] sm:$0xf0]  ;;  %v2081_v3 = vld [vmem:[#allocation8 + $0x74] sm:$0xf] }
  0x65   : > { %794 = vmatpush.bf16.msra.mxu1 %v1742_v29  ;;  %v1881_v62 = vld [vmem:[#allocation8 + $0xf0] sm:$0xf]  ;;  %v1818_v1 = vor.u32 %v2082_v61, %v1817_v60  ;;  %v2098_v2 = vld [vmem:[#allocation8 + $0xf4] sm:$0xf0]  ;;  %v1819_v4 = vld [vmem:[#allocation8 + $0x78] sm:$0xf0] }
  0x66   : > { %v647_v12 = vadd.f32 %v2278_v8, %v646_v11  ;;  %v1882_v6 = vor.u32 %v2098_v2, %v1881_v62  ;;  %v1822_v7 = vor.u32 %v2081_v3, %v1819_v4  ;;  %v1883_v9 = vld [vmem:[#allocation8 + $0xf8] sm:$0xf0]  ;;  %v1809_v10 = vld [vmem:[#allocation8 + $0x60] sm:$0xf]  ;;  %v2079_v20 = vld [vmem:[#allocation8 + $0x64] sm:$0xf] }
  0x67   : > { %1023 = vmatpush.bf16.msra.mxu2 %v1818_v1  ;;  %v1811_v21 = vld [vmem:[#allocation8 + $0x68] sm:$0xf0]  ;;  %v2095_v23 = vld [vmem:[#allocation8 + $0xe4] sm:$0xf]  ;;  %v2078_v40 = vld [vmem:[#allocation8 + $0x54] sm:$0xf0] }
  0x68   : > { %v2916_v13 = vsel %vm648_vm0, %v2278_v8, %v647_v12  ;;  %782 = vmatpush.bf16.msra.mxu0 %v1730_v33  ;;  %v2097_v8 = vld [vmem:[#allocation8 + $0xf4] sm:$0xf]  ;;  %v2080_v12 = vld [vmem:[#allocation8 + $0x64] sm:$0xf0]  ;;  %1036 = vmatpush.bf16.msra.mxu3 %v1882_v6  ;;  %v1814_v22 = vor.u32 %v2079_v20, %v1811_v21  ;;  %v1875_v24 = vld [vmem:[#allocation8 + $0xe8] sm:$0xf0] }
  0x69   : > { %795 = vmatpush.bf16.msra.mxu1 %v1734_v35  ;;  %v1886_v11 = vor.u32 %v2097_v8, %v1883_v9  ;;  %v1810_v18 = vor.u32 %v2080_v12, %v1809_v10  ;;  %v1878_v25 = vor.u32 %v2095_v23, %v1875_v24  ;;  %v2271_v32 = vld [vmem:[%s2993_s1] ss:$0 sm:$0xff]  ;;  %v2094_v43 = vld [vmem:[#allocation8 + $0xd4] sm:$0xf0]  ;;  %v2077_v44 = vld [vmem:[#allocation8 + $0x54] sm:$0xf] }
  0x6a   : > { %v2272_v35 = vld [vmem:[%s2994_s2] ss:$0 sm:$0xff]  ;;  %v2093_v48 = vld [vmem:[#allocation8 + $0xd4] sm:$0xf]  ;;  %v1793_v49 = vld [vmem:[#allocation8 + $0x40] sm:$0xf] }
  0x6b   : > { %1024 = vmatpush.bf16.msra.mxu2 %v1810_v18  ;;  %v1857_v52 = vld [vmem:[#allocation8 + $0xc0] sm:$0xf]  ;;  %v2092_v53 = vld [vmem:[#allocation8 + $0xc4] sm:$0xf0]  ;;  %v2075_v56 = vld [vmem:[#allocation8 + $0x44] sm:$0xf] }
  0x6c   : > { %783 = vmatpush.bf16.msra.mxu0 %v1722_v39  ;;  %v1801_v39 = vld [vmem:[#allocation8 + $0x50] sm:$0xf]  ;;  %v1795_v57 = vld [vmem:[#allocation8 + $0x48] sm:$0xf0]  ;;  %v2090_v3 = vld [vmem:[#allocation8 + $0xb4] sm:$0xf0] }
  0x6d   : > { %796 = vmatpush.bf16.msra.mxu1 %v1726_v41  ;;  %v1865_v41 = vld [vmem:[#allocation8 + $0xd0] sm:$0xf]  ;;  %v1802_v42 = vor.u32 %v2078_v40, %v1801_v39  ;;  %v1859_v60 = vld [vmem:[#allocation8 + $0xc8] sm:$0xf0]  ;;  %v2073_v4 = vld [vmem:[#allocation8 + $0x34] sm:$0xf] }
  0x6e   : > { %v1866_v46 = vor.u32 %v2094_v43, %v1865_v41  ;;  %v1785_v62 = vld [vmem:[#allocation8 + $0x30] sm:$0xf]  ;;  %v2089_v8 = vld [vmem:[#allocation8 + $0xb4] sm:$0xf]  ;;  %v1851_v9 = vld [vmem:[#allocation8 + $0xb8] sm:$0xf0] }
  0x6f   : > { %1025 = vmatpush.bf16.msra.mxu2 %v1802_v42  ;;  %v1849_v1 = vld [vmem:[#allocation8 + $0xb0] sm:$0xf]  ;;  %v1777_v10 = vld [vmem:[#allocation8 + $0x20] sm:$0xf]  ;;  %v2072_v12 = vld [vmem:[#allocation8 + $0x24] sm:$0xf0] }
  0x70   : > { %784 = vmatpush.bf16.msra.mxu0 %v1714_v45  ;;  %v1803_v45 = vld [vmem:[#allocation8 + $0x58] sm:$0xf0]  ;;  %v1850_v6 = vor.u32 %v2090_v3, %v1849_v1  ;;  %v1779_v20 = vld [vmem:[#allocation8 + $0x28] sm:$0xf0]  ;;  %v2087_v21 = vld [vmem:[#allocation8 + $0xa4] sm:$0xf] }
  0x71   : > { %797 = vmatpush.bf16.msra.mxu1 %v1718_v47  ;;  %v1806_v47 = vor.u32 %v2077_v44, %v1803_v45  ;;  %v1843_v23 = vld [vmem:[#allocation8 + $0xa8] sm:$0xf0]  ;;  %v1769_v24 = vld [vmem:[#allocation8 + $0x10] sm:$0xf]  ;;  %v2084_v40 = vld [vmem:[#allocation8 + $0x84] sm:$0xf0] }
  0x72   : > { %v2067_v41 = vld [vmem:[#allocation8 + $0x4] sm:$0xf]  ;;  %v1763_v42 = vld [vmem:[#allocation8 + $0x8] sm:$0xf0]  ;;  %s3036_s4 = sld [smem:[#allocation32_spill]]  ;;  %s2048_s11 = sshll.u32 %s2764_s25, 3 }
  0x73   : > { %v2083_v43 = vld [vmem:[#allocation8 + $0x84] sm:$0xf]  ;;  %v1827_v44 = vld [vmem:[#allocation8 + $0x88] sm:$0xf0]  ;;  %s3037_s8 = sld [smem:[#allocation33_spill]]  ;;  %s637_s3 = scalar_lea.vmem [#allocation17], %s1685_s15 }
  0x74   : > { %785 = vmatpush.bf16.msra.mxu0 %v1706_v51  ;;  %v2076_v51 = vld [vmem:[#allocation8 + $0x44] sm:$0xf0]  ;;  %s1522_s9 = sshll.u32 %s637_s3, 4  ;;  %s1510_s22 = scalar_lea.sflag [#allocation4], %s2887_s23  ;;  %s1523_s9 = int_to_ptr.vmem [resolvable:$true] %s1522_s9 }
  0x75   : > { %798 = vmatpush.bf16.msra.mxu1 %v1710_v55  ;;  %v1794_v54 = vor.u32 %v2076_v51, %v1793_v49  ;;  %v1858_v55 = vor.u32 %v2092_v53, %v1857_v52  ;;  %v2114_v49 = vld [vmem:[#allocation10 + $0x78] sm:$0xff] }
  0x77   : > { %1026 = vmatpush.bf16.msra.mxu2 %v1794_v54 }
  0x78   : > { %786 = vmatpush.bf16.msra.mxu0 %v1698_v58  ;;  %v2091_v58 = vld [vmem:[#allocation8 + $0xc4] sm:$0xf] }
  0x79   : > { %799 = vmatpush.bf16.msra.mxu1 %v1702_v59  ;;  %v1798_v59 = vor.u32 %v2075_v56, %v1795_v57  ;;  %v1862_v61 = vor.u32 %v2091_v58, %v1859_v60  ;;  %s1520_s30 = scalar_lea.hbm %s3037_s8, %s2048_s11  ;;  %s2583_s15 = scalar_lea.hbm %s3037_s8, 16 }
  0x7c   : > { %1049 = vmatpush.bf16.msrb.mxu0 %v1822_v7 }
  0x7d   : > { %1062 = vmatpush.bf16.msrb.mxu1 %v1886_v11  ;;  %v1854_v11 = vor.u32 %v2089_v8, %v1851_v9 }
  0x80   : > { %1050 = vmatpush.bf16.msrb.mxu0 %v1814_v22 }
  0x81   : > { %1063 = vmatpush.bf16.msrb.mxu1 %v1878_v25  ;;  %v2070_v25 = vld [vmem:[#allocation8 + $0x14] sm:$0xf0] }
  0x84   : > { %1051 = vmatpush.bf16.msrb.mxu0 %v1806_v47  ;;  %v1766_v47 = vor.u32 %v2067_v41, %v1763_v42 }
  0x88   : > { %1052 = vmatpush.bf16.msrb.mxu0 %v1798_v59 }
  0xcc   : > { %v642_v14 = vpop.xlane.xlu0 %641 }
  0xcd   : > { %v650_v15 = vmul.f32 %v2916_v13, %v642_v14  ;;  %v1873_v14 = vld [vmem:[#allocation8 + $0xe0] sm:$0xf] }
  0xcf   : > { %v2920_v16 = vsub.f32 %v2913_v0, %v650_v15  ;;  %v2096_v15 = vld [vmem:[#allocation8 + $0xe4] sm:$0xf0] }
  0xd0   : > { %v1874_v19 = vor.u32 %v2096_v15, %v1873_v14  ;;  %v1841_v14 = vld [vmem:[#allocation8 + $0xa0] sm:$0xf]  ;;  %v2088_v15 = vld [vmem:[#allocation8 + $0xa4] sm:$0xf0] }
  0xd1   : > { %v652_v17 = vmul.f32 %v2920_v16, %v2920_v16  ;;  %v1842_v18 = vor.u32 %v2088_v15, %v1841_v14 }
  0xd2   : > { %1037 = vmatpush.bf16.msra.mxu3 %v1874_v19  ;;  %v2071_v19 = vld [vmem:[#allocation8 + $0x24] sm:$0xf] }
  0xd3   : > { %653 = vadd.xlane.f32.xlu0 %v652_v17  ;;  %v1782_v22 = vor.u32 %v2071_v19, %v1779_v20  ;;  %v2112_v19 = vld [vmem:[#allocation10 + $0x68] sm:$0xff]  ;;  %v2105_v20 = vld [vmem:[#allocation10 + $0x30] sm:$0xff] }
  0xd6   : > { %1038 = vmatpush.bf16.msra.mxu3 %v1866_v46 }
  0xda   : > { %1039 = vmatpush.bf16.msra.mxu3 %v1858_v55 }
  0xde   : > { %1040 = vmatpush.bf16.msra.mxu3 %v1850_v6 }
  0xe2   : > { %1041 = vmatpush.bf16.msra.mxu3 %v1842_v18  ;;  %v2106_v18 = vld [vmem:[#allocation10 + $0x38] sm:$0xff] }
 0x146   : > { %v654_v63 = vpop.xlane.xlu0 %653 }
 0x147   : > { %v655_v5 = vmul.f32 %v654_v63, %v2916_v13  ;;  %v2074_v63 = vld [vmem:[#allocation8 + $0x34] sm:$0xf0] }
 0x148   : > { %v1786_v2 = vor.u32 %v2074_v63, %v1785_v62 }
 0x149   : > { %v656_v17 = vadd.f32 1e-05, %v655_v5  ;;  %v1787_v5 = vld [vmem:[#allocation8 + $0x38] sm:$0xf0] }
 0x14a   : > { %v1790_v7 = vor.u32 %v2073_v4, %v1787_v5  ;;  %1027 = vmatpush.bf16.msra.mxu2 %v1786_v2 }
 0x14b   : > { %2279 = vrsqrt.f32 %v656_v17  ;;  %vm663_vm2 = vweird.f32 %v656_v17 }
 0x14c   : > { %1053 = vmatpush.bf16.msrb.mxu0 %v1790_v7 }
 0x150   : > { %1054 = vmatpush.bf16.msrb.mxu0 %v1782_v22  ;;  %v2104_v22 = vld [vmem:[#allocation10 + $0x28] sm:$0xff] }
 0x151   : > { %v2280_v26 = vpop.eup %2279 }
 0x152   : > { %v658_v27 = vmul.f32 %v2280_v26, %v656_v17  ;;  %vm664_vm1 = vweird.f32 %v2280_v26  ;;  %v1778_v17 = vor.u32 %v2072_v12, %v1777_v10 }
 0x153   : > { %vm665_vm3 = vmor %vm663_vm2, %vm664_vm1 }
 0x154   : > { %v659_v28 = vmul.f32 %v2280_v26, %v658_v27  ;;  %v1833_v27 = vld [vmem:[#allocation8 + $0x90] sm:$0xf]  ;;  %1028 = vmatpush.bf16.msra.mxu2 %v1778_v17 }
 0x155   : > { %v2113_v17 = vld [vmem:[#allocation10 + $0x70] sm:$0xff] }
 0x156   : > { %v660_v29 = vmul.f32 0.5, %v659_v28  ;;  %v2086_v28 = vld [vmem:[#allocation8 + $0x94] sm:$0xf0] }
 0x158   : > { %v661_v30 = vsub.f32 1.5, %v660_v29  ;;  %v2069_v29 = vld [vmem:[#allocation8 + $0x14] sm:$0xf] }
 0x15a   : > { %v662_v31 = vmul.f32 %v2280_v26, %v661_v30  ;;  %v1770_v30 = vor.u32 %v2070_v25, %v1769_v24  ;;  %v2103_v24 = vld [vmem:[#allocation10 + $0x20] sm:$0xff]  ;;  %v2109_v25 = vld [vmem:[#allocation10 + $0x50] sm:$0xff] }
 0x15c   : > { %v666_v33 = vsel %vm665_vm3, %v2280_v26, %v662_v31  ;;  %v1846_v26 = vor.u32 %v2087_v21, %v1843_v23  ;;  %v1771_v31 = vld [vmem:[#allocation8 + $0x18] sm:$0xf0]  ;;  %1029 = vmatpush.bf16.msra.mxu2 %v1770_v30  ;;  %v2111_v21 = vld [vmem:[#allocation10 + $0x60] sm:$0xff]  ;;  %v2100_v30 = vld [vmem:[#allocation10 + $0x8] sm:$0xff] }
 0x15d   : > { %v667_v34 = vmul.f32 %v666_v33, %v2920_v16  ;;  %v1867_v16 = vld [vmem:[#allocation8 + $0xd8] sm:$0xf0] }
 0x15e   : > { %v1870_v50 = vor.u32 %v2093_v48, %v1867_v16  ;;  %v1835_v33 = vld [vmem:[#allocation8 + $0x98] sm:$0xf0]  ;;  %v1830_v48 = vor.u32 %v2083_v43, %v1827_v44 }
 0x15f   : > { %v671_v36 = vmul.f32 %v2271_v32, %v667_v34  ;;  %v2085_v32 = vld [vmem:[#allocation8 + $0x94] sm:$0xf]  ;;  %v1834_v34 = vor.u32 %v2086_v28, %v1833_v27  ;;  %v693_v16 = vld [vmem:[#allocation7] sm:$0x3]  ;;  %v2108_v27 = vld [vmem:[#allocation10 + $0x48] sm:$0xff] }
 0x160   : > { %1064 = vmatpush.bf16.msrb.mxu1 %v1870_v50  ;;  %v1838_v39 = vor.u32 %v2085_v32, %v1835_v33  ;;  %v695_v50 = vperm.slane %v693_v16, 0  ;;  %v696_v51 = vperm.slane %v693_v16, 1  ;;  %v2110_v23 = vld [vmem:[#allocation10 + $0x58] sm:$0xff]  ;;  %v2101_v28 = vld [vmem:[#allocation10 + $0x10] sm:$0xff]  ;;  %v2099_v32 = vld [vmem:[#allocation10] sm:$0xff] }
 0x161   : > { %v675_v37 = vadd.f32 %v2272_v35, %v671_v36  ;;  %v1774_v35 = vor.u32 %v2069_v29, %v1771_v31  ;;  %v1761_v36 = vld [vmem:[#allocation8] sm:$0xf]  ;;  %1042 = vmatpush.bf16.msra.mxu3 %v1834_v34  ;;  %v857_v31 = vld [vmem:[%s2998_s6] sm:$0x3] }
 0x162   : > { %v2107_v29 = vld [vmem:[#allocation10 + $0x40] sm:$0xff]  ;;  %v860_v33 = vperm.slane %v857_v31, 1 }
 0x163   : > { %v692_v38 = vpack.c.bf16 %v675_v37, %v675_v37  ;;  %v2068_v37 = vld [vmem:[#allocation8 + $0x4] sm:$0xf0]  ;;  %1055 = vmatpush.bf16.msrb.mxu0 %v1774_v35 }
 0x164   : > { %1065 = vmatpush.bf16.msrb.mxu1 %v1862_v61  ;;  %v1762_v45 = vor.u32 %v2068_v37, %v1761_v36 }
 0x165   : > { %787 = vmatmul.bf16.vlgmr.msra.gmra.mxu0 %v692_v38  ;;  %800 = vmatmul.bf16.vlgmr.msra.gmra.mxu1 %v692_v38  ;;  %v1825_v38 = vld [vmem:[#allocation8 + $0x80] sm:$0xf] }
 0x166   : > { %v1826_v46 = vor.u32 %v2084_v40, %v1825_v38  ;;  %1030 = vmatpush.bf16.msra.mxu2 %v1762_v45  ;;  %v859_v38 = vperm.slane %v857_v31, 0 }
 0x167   : > { %1056 = vmatpush.bf16.msrb.mxu0 %v1766_v47 }
 0x168   : > { %1066 = vmatpush.bf16.msrb.mxu1 %v1854_v11  ;;  %1043 = vmatpush.bf16.msra.mxu3 %v1826_v46 }
 0x16a   : > { %1223 = vmatpush.bf16.msrb.mxu2 %v2106_v18 }
 0x16c   : > { %1067 = vmatpush.bf16.msrb.mxu1 %v1846_v26  ;;  %1236 = vmatpush.bf16.msrb.mxu3 %v2114_v49  ;;  %v2102_v26 = vld [vmem:[#allocation10 + $0x18] sm:$0xff] }
 0x16e   : > { %1224 = vmatpush.bf16.msrb.mxu2 %v2105_v20 }
 0x170   : > { %1068 = vmatpush.bf16.msrb.mxu1 %v1838_v39  ;;  %1237 = vmatpush.bf16.msrb.mxu3 %v2113_v17  ;;  %v2011_v17 = vld [vmem:[#allocation13 + $0x78] sm:$0xf0] }
 0x172   : > { %1225 = vmatpush.bf16.msrb.mxu2 %v2104_v22  ;;  %v2001_v22 = vld [vmem:[#allocation13 + $0x60] sm:$0xf] }
 0x174   : > { %1069 = vmatpush.bf16.msrb.mxu1 %v1830_v48  ;;  %1238 = vmatpush.bf16.msrb.mxu3 %v2112_v19 }
 0x176   : > { %1226 = vmatpush.bf16.msrb.mxu2 %v2103_v24  ;;  %v2127_v24 = vld [vmem:[#allocation13 + $0x64] sm:$0xf] }
 0x178   : > { %1239 = vmatpush.bf16.msrb.mxu3 %v2111_v21 }
 0x17a   : > { %1227 = vmatpush.bf16.msrb.mxu2 %v2102_v26  ;;  %v2003_v26 = vld [vmem:[#allocation13 + $0x68] sm:$0xf0] }
 0x17c   : > { %1240 = vmatpush.bf16.msrb.mxu3 %v2110_v23  ;;  %v2128_v23 = vld [vmem:[#allocation13 + $0x64] sm:$0xf0] }
 0x17e   : > { %1228 = vmatpush.bf16.msrb.mxu2 %v2101_v28  ;;  %v1993_v28 = vld [vmem:[#allocation13 + $0x50] sm:$0xf] }
 0x180   : > { %1241 = vmatpush.bf16.msrb.mxu3 %v2109_v25  ;;  %v2002_v25 = vor.u32 %v2128_v23, %v2001_v22  ;;  %v2134_v22 = vld [vmem:[#allocation14 + $0x18] sm:$0xff]  ;;  %v2133_v23 = vld [vmem:[#allocation14 + $0x10] sm:$0xff] }
 0x182   : > { %1229 = vmatpush.bf16.msrb.mxu2 %v2100_v30  ;;  %v2125_v30 = vld [vmem:[#allocation13 + $0x54] sm:$0xf] }
 0x184   : > { %1242 = vmatpush.bf16.msrb.mxu3 %v2108_v27  ;;  %v2006_v27 = vor.u32 %v2127_v24, %v2003_v26  ;;  %v2131_v24 = vld [vmem:[#allocation14] sm:$0xff] }
 0x186   : > { %1230 = vmatpush.bf16.msrb.mxu2 %v2099_v32  ;;  %v1995_v32 = vld [vmem:[#allocation13 + $0x58] sm:$0xf0] }
 0x188   : > { %1243 = vmatpush.bf16.msrb.mxu3 %v2107_v29  ;;  %v2126_v29 = vld [vmem:[#allocation13 + $0x54] sm:$0xf0] }
 0x189   : > { %v1994_v31 = vor.u32 %v2126_v29, %v1993_v28 }
 0x1e2   : > { %v788_v52 = vpop.f32.mrf.mxu0  ;;  %v801_v53 = vpop.f32.mrf.mxu1 }
 0x1e3   : > { %v789_v54 = vadd.f32 %v788_v52, %v695_v50  ;;  %v802_v55 = vadd.f32 %v801_v53, %v696_v51 }
 0x1e5   : > { %v807_v56 = vmul.f32 0.044715, %v789_v54  ;;  %v808_v57 = vmul.f32 0.044715, %v802_v55  ;;  %v805_v7 = vmul.f32 0.5, %v789_v54  ;;  %v806_v9 = vmul.f32 0.5, %v802_v55 }
 0x1e7   : > { %v809_v58 = vmul.f32 %v807_v56, %v789_v54  ;;  %v810_v59 = vmul.f32 %v808_v57, %v802_v55 }
 0x1e9   : > { %v811_v60 = vmul.f32 %v809_v58, %v789_v54  ;;  %v812_v61 = vmul.f32 %v810_v59, %v802_v55 }
 0x1ea   : > { %v790_v62 = vpop.f32.mrf.mxu0  ;;  %v803_v63 = vpop.f32.mrf.mxu1 }
 0x1eb   : > { %v813_v1 = vadd.f32 %v811_v60, %v789_v54  ;;  %v814_v2 = vadd.f32 %v812_v61, %v802_v55 }
 0x1ed   : > { %v815_v3 = vmul.f32 0.7978846, %v813_v1  ;;  %v816_v4 = vmul.f32 0.7978846, %v814_v2 }
 0x1ef   : > { %2281 = vtanh.f32 %v815_v3 }
 0x1f0   : > { %2283 = vtanh.f32 %v816_v4 }
 0x1f5   : > { %v2282_v5 = vpop.eup %2281 }
 0x1f6   : > { %v2284_v6 = vpop.eup %2283  ;;  %v819_v8 = vadd.f32 1.0, %v2282_v5 }
 0x1f7   : > { %v820_v10 = vadd.f32 1.0, %v2284_v6  ;;  %v2273_v6 = vld [vmem:[#allocation11] ss:$0 sm:$0xff] }
 0x1f8   : > { %v821_v11 = vmul.f32 %v819_v8, %v805_v7 }
 0x1f9   : > { %v822_v12 = vmul.f32 %v820_v10, %v806_v9 }
 0x1fa   : > { %v823_v14 = vpack.c.bf16 %v821_v11, %v821_v11  ;;  %v2009_v11 = vld [vmem:[#allocation13 + $0x70] sm:$0xf] }
 0x1fb   : > { %v824_v15 = vpack.c.bf16 %v822_v12, %v822_v12  ;;  %v2130_v12 = vld [vmem:[#allocation13 + $0x74] sm:$0xf0] }
 0x1fc   : > { %1031 = vmatmul.bf16.vlgmr.msra.gmra.mxu2 %v823_v14  ;;  %1057 = vmatmul.bf16.vlgmr.msrb.gmra.mxu0 %v823_v14  ;;  %v2129_v14 = vld [vmem:[#allocation13 + $0x74] sm:$0xf] }
 0x1fd   : > { %1044 = vmatmul.bf16.vlgmr.msra.gmra.mxu3 %v824_v15  ;;  %1070 = vmatmul.bf16.vlgmr.msrb.gmra.mxu1 %v824_v15  ;;  %v2010_v15 = vor.u32 %v2130_v12, %v2009_v11  ;;  %v2014_v18 = vor.u32 %v2129_v14, %v2011_v17  ;;  %v2274_v11 = vld [vmem:[%s3034_s29] ss:$0 sm:$0xff]  ;;  %s1524_s29 = sshll.u32 %s1520_s30, 4  ;;  %s1525_s29 = int_to_ptr.hbm [resolvable:$true] %s1524_s29 }
 0x1fe   : > { %s2577_s27 = sshra.s32 %s1525_s29, 4  ;;  %s2578_s27 = int_to_ptr.hbm [resolvable:$true] %s2577_s27 }
 0x1ff   : > { %1388 = vmatpush.bf16.msra.mxu0 %v2010_v15  ;;  %1401 = vmatpush.bf16.msra.mxu1 %v2014_v18  ;;  %s2579_s25 = scalar_lea.hbm %s2578_s27, 8  ;;  %p2584_p12 = scmp.lt.s32.totalorder %s2578_s27, %s3037_s8 }
 0x200   : > { %p2580_p1 = scmp.ne.s32.totalorder %s2578_s27, %s2579_s25  ;;  %p2585_p7 = scmp.lt.s32.totalorder %s2583_s15, %s2579_s25 }
 0x202   : > { %p2581_p3 = pnand %p2580_p1, %p2856_p4  ;;  %p2586_p8 = por %p2585_p7, %p2584_p12 }
 0x203   : > { %1389 = vmatpush.bf16.msra.mxu0 %v2002_v25  ;;  %1402 = vmatpush.bf16.msra.mxu1 %v2006_v27  ;;  %v1302_v25 = vld [vmem:[%s3036_s4] sm:$0x3] }
 0x204   : > { %v1305_v26 = vperm.slane %v1302_v25, 1  ;;  %p2582_p5 = pneg %p2581_p3 }
 0x206   : > { %p2587_p9 = pnand %p2586_p8, %p2582_p5 }
 0x207   : > { %1390 = vmatpush.bf16.msra.mxu0 %v1994_v31 }
 0x279   : > { %v1058_v34 = vpop.f32.mrf.mxu0 }
 0x27a   : > { %v1059_v35 = vadd.f32 %v1058_v34, %v860_v33  ;;  %v1071_v36 = vpop.f32.mrf.mxu1  ;;  %v1998_v33 = vor.u32 %v2125_v30, %v1995_v32  ;;  %v1985_v34 = vld [vmem:[#allocation13 + $0x40] sm:$0xf] }
 0x27c   : > { %v1072_v37 = vadd.f32 %v1071_v36, %v1059_v35  ;;  %1403 = vmatpush.bf16.msra.mxu1 %v1998_v33  ;;  %v2124_v35 = vld [vmem:[#allocation13 + $0x44] sm:$0xf0]  ;;  %v2123_v36 = vld [vmem:[#allocation13 + $0x44] sm:$0xf] }
 0x27e   : > { %v1078_v39 = vmul.f32 0.044715, %v1072_v37  ;;  %v1076_v57 = vmul.f32 0.5, %v1072_v37 }
 0x27f   : > { %v1032_v40 = vpop.f32.mrf.mxu2 }
 0x280   : > { %v1080_v41 = vmul.f32 %v1078_v39, %v1072_v37  ;;  %v1033_v42 = vadd.f32 %v1032_v40, %v859_v38  ;;  %v1045_v43 = vpop.f32.mrf.mxu3  ;;  %v1987_v38 = vld [vmem:[#allocation13 + $0x48] sm:$0xf0]  ;;  %v1977_v40 = vld [vmem:[#allocation13 + $0x30] sm:$0xf] }
 0x281   : > { %v1060_v44 = vpop.f32.mrf.mxu0  ;;  %v1990_v39 = vor.u32 %v2123_v36, %v1987_v38 }
 0x282   : > { %v1046_v45 = vadd.f32 %v1045_v43, %v1033_v42  ;;  %v1073_v46 = vpop.f32.mrf.mxu1  ;;  %v1082_v47 = vmul.f32 %v1080_v41, %v1072_v37  ;;  %v2122_v41 = vld [vmem:[#allocation13 + $0x34] sm:$0xf0]  ;;  %v2121_v42 = vld [vmem:[#allocation13 + $0x34] sm:$0xf]  ;;  %v1979_v44 = vld [vmem:[#allocation13 + $0x38] sm:$0xf0] }
 0x283   : > { %1404 = vmatpush.bf16.msra.mxu1 %v1990_v39  ;;  %v1978_v43 = vor.u32 %v2122_v41, %v1977_v40  ;;  %v1969_v46 = vld [vmem:[#allocation13 + $0x20] sm:$0xf] }
 0x284   : > { %v1077_v48 = vmul.f32 0.044715, %v1046_v45  ;;  %v1084_v16 = vadd.f32 %v1082_v47, %v1072_v37  ;;  %v1075_v62 = vmul.f32 0.5, %v1046_v45  ;;  %v1986_v37 = vor.u32 %v2124_v35, %v1985_v34  ;;  %v2120_v47 = vld [vmem:[#allocation13 + $0x24] sm:$0xf0] }
 0x286   : > { %v1079_v49 = vmul.f32 %v1077_v48, %v1046_v45  ;;  %v1086_v50 = vmul.f32 0.7978846, %v1084_v16  ;;  %1391 = vmatpush.bf16.msra.mxu0 %v1986_v37  ;;  %v2119_v48 = vld [vmem:[#allocation13 + $0x24] sm:$0xf]  ;;  %v1970_v16 = vor.u32 %v2120_v47, %v1969_v46  ;;  %v1304_v37 = vperm.slane %v1302_v25, 0 }
 0x287   : > { %v1034_v51 = vpop.f32.mrf.mxu2 }
 0x288   : > { %v1047_v52 = vpop.f32.mrf.mxu3  ;;  %2285 = vtanh.f32 %v1086_v50  ;;  %v1081_v53 = vmul.f32 %v1079_v49, %v1046_v45  ;;  %v1971_v49 = vld [vmem:[#allocation13 + $0x28] sm:$0xf0]  ;;  %v1961_v51 = vld [vmem:[#allocation13 + $0x10] sm:$0xf] }
 0x289   : > { %v1974_v50 = vor.u32 %v2119_v48, %v1971_v49  ;;  %v2118_v52 = vld [vmem:[#allocation13 + $0x14] sm:$0xf0] }
 0x28a   : > { %v1083_v54 = vadd.f32 %v1081_v53, %v1046_v45  ;;  %v1982_v45 = vor.u32 %v2121_v42, %v1979_v44  ;;  %1392 = vmatpush.bf16.msra.mxu0 %v1978_v43  ;;  %v2117_v53 = vld [vmem:[#allocation13 + $0x14] sm:$0xf] }
 0x28c   : > { %v1085_v55 = vmul.f32 0.7978846, %v1083_v54  ;;  %1405 = vmatpush.bf16.msra.mxu1 %v1982_v45  ;;  %v1962_v54 = vor.u32 %v2118_v52, %v1961_v51  ;;  %v2276_v45 = vld [vmem:[#allocation16] ss:$0 sm:$0xff] }
 0x28e   : > { %v2286_v56 = vpop.eup %2285  ;;  %2287 = vtanh.f32 %v1085_v55  ;;  %1393 = vmatpush.bf16.msra.mxu0 %v1970_v16  ;;  %v1963_v55 = vld [vmem:[#allocation13 + $0x18] sm:$0xf0] }
 0x28f   : > { %v1090_v58 = vadd.f32 1.0, %v2286_v56  ;;  %v1953_v56 = vld [vmem:[#allocation13] sm:$0xf] }
 0x290   : > { %1406 = vmatpush.bf16.msra.mxu1 %v1974_v50 }
 0x291   : > { %v1092_v59 = vmul.f32 %v1090_v58, %v1076_v57  ;;  %v2116_v57 = vld [vmem:[#allocation13 + $0x4] sm:$0xf0]  ;;  %v1966_v58 = vor.u32 %v2117_v53, %v1963_v55 }
 0x292   : > { %1394 = vmatpush.bf16.msra.mxu0 %v1962_v54 }
 0x293   : > { %v1094_v60 = vpack.c.bf16 %v1092_v59, %v1092_v59  ;;  %v2115_v59 = vld [vmem:[#allocation13 + $0x4] sm:$0xf] }
 0x294   : > { %v2288_v61 = vpop.eup %2287  ;;  %1407 = vmatpush.bf16.msra.mxu1 %v1966_v58 }
 0x295   : > { %1244 = vmatmul.bf16.vlgmr.msrb.gmra.mxu3 %v1094_v60  ;;  %v1089_v63 = vadd.f32 1.0, %v2288_v61  ;;  %v1955_v60 = vld [vmem:[#allocation13 + $0x8] sm:$0xf0]  ;;  %v1954_v61 = vor.u32 %v2116_v57, %v1953_v56 }
 0x297   : > { %v1091_v1 = vmul.f32 %v1089_v63, %v1075_v62  ;;  %v1958_v62 = vor.u32 %v2115_v59, %v1955_v60  ;;  %1395 = vmatpush.bf16.msra.mxu0 %v1954_v61  ;;  %v2138_v63 = vld [vmem:[#allocation14 + $0x38] sm:$0xff] }
 0x298   : > { %1489 = vmatpush.bf16.msra.mxu2 %v2138_v63 }
 0x299   : > { %v1093_v2 = vpack.c.bf16 %v1091_v1, %v1091_v1  ;;  %1408 = vmatpush.bf16.msra.mxu1 %v1958_v62 }
 0x29b   : > { %1231 = vmatmul.bf16.vlgmr.msrb.gmra.mxu2 %v1093_v2 }
 0x318   : > { %v1245_v3 = vpop.f32.mrf.mxu3 }
 0x31e   : > { %v1232_v4 = vpop.f32.mrf.mxu2 }
 0x31f   : > { %v1246_v5 = vadd.f32 %v1245_v3, %v1232_v4 }
 0x320   : > { %v1247_v7 = vpop.f32.mrf.mxu3 }
 0x321   : > { %v1249_v8 = vadd.f32 %v1246_v5, %v2913_v0 }
 0x323   : > { %v2936_v9 = vadd.f32 %v2273_v6, %v1249_v8 }
 0x325   : > { %1257 = vadd.xlane.f32.xlu1 %v2936_v9 }
 0x326   : > { %v1234_v10 = vpop.f32.mrf.mxu2 }
 0x398   : > { %v1258_v19 = vpop.xlane.xlu1 %1257 }
 0x399   : > { %v1259_v20 = vmul.f32 %v1258_v19, %v2916_v13  ;;  %v2137_v19 = vld [vmem:[#allocation14 + $0x30] sm:$0xff] }
 0x39a   : > { %1490 = vmatpush.bf16.msra.mxu2 %v2137_v19 }
 0x39b   : > { %v2941_v21 = vsub.f32 %v2936_v9, %v1259_v20  ;;  %v2136_v20 = vld [vmem:[#allocation14 + $0x28] sm:$0xff] }
 0x39d   : > { %v1261_v0 = vmul.f32 %v2941_v21, %v2941_v21 }
 0x39e   : > { %1491 = vmatpush.bf16.msra.mxu2 %v2136_v20 }
 0x39f   : > { %1262 = vadd.xlane.f32.xlu1 %v1261_v0  ;;  %v2135_v0 = vld [vmem:[#allocation14 + $0x20] sm:$0xff] }
 0x3a2   : > { %1492 = vmatpush.bf16.msra.mxu2 %v2135_v0 }
 0x3a6   : > { %1493 = vmatpush.bf16.msra.mxu2 %v2134_v22 }
 0x3aa   : > { %1494 = vmatpush.bf16.msra.mxu2 %v2133_v23 }
 0x412   : > { %v1263_v1 = vpop.xlane.xlu1 %1262 }
 0x413   : > { %v1264_v2 = vmul.f32 %v1263_v1, %v2916_v13  ;;  %v2275_v13 = vld [vmem:[%s3035_s24] ss:$0 sm:$0xff] }
 0x415   : > { %v1265_v3 = vadd.f32 1e-05, %v1264_v2 }
 0x417   : > { %2289 = vrsqrt.f32 %v1265_v3  ;;  %vm1272_vm5 = vweird.f32 %v1265_v3 }
 0x41d   : > { %v2290_v4 = vpop.eup %2289 }
 0x41e   : > { %v1267_v5 = vmul.f32 %v2290_v4, %v1265_v3  ;;  %vm1273_vm4 = vweird.f32 %v2290_v4 }
 0x41f   : > { %vm1274_vm6 = vmor %vm1272_vm5, %vm1273_vm4 }
 0x420   : > { %v1268_v6 = vmul.f32 %v2290_v4, %v1267_v5 }
 0x422   : > { %v1269_v7 = vmul.f32 0.5, %v1268_v6 }
 0x424   : > { %v1270_v8 = vsub.f32 1.5, %v1269_v7 }
 0x426   : > { %v1271_v10 = vmul.f32 %v2290_v4, %v1270_v8 }
 0x428   : > { %v1275_v12 = vsel %vm1274_vm6, %v2290_v4, %v1271_v10 }
 0x429   : > { %v1276_v14 = vmul.f32 %v1275_v12, %v2941_v21  ;;  %v2132_v21 = vld [vmem:[#allocation14 + $0x8] sm:$0xff] }
 0x42a   : > { %1495 = vmatpush.bf16.msra.mxu2 %v2132_v21 }
 0x42b   : > { %v1280_v15 = vmul.f32 %v2274_v11, %v1276_v14 }
 0x42d   : > { %v1284_v17 = vadd.f32 %v2275_v13, %v1280_v15 }
 0x42e   : > { %1496 = vmatpush.bf16.msra.mxu2 %v2131_v24 }
 0x42f   : > { %v1301_v18 = vpack.c.bf16 %v1284_v17, %v1284_v17 }
 0x431   : > { %1396 = vmatmul.bf16.vlgmr.msra.gmra.mxu0 %v1301_v18  ;;  %1409 = vmatmul.bf16.vlgmr.msra.gmra.mxu1 %v1301_v18 }
 0x4ae   : > { %v1397_v27 = vpop.f32.mrf.mxu0  ;;  %v1410_v28 = vpop.f32.mrf.mxu1 }
 0x4af   : > { %v1411_v29 = vadd.f32 %v1410_v28, %v1305_v26  ;;  %v1398_v41 = vadd.f32 %v1397_v27, %v1304_v37 }
 0x4b1   : > { %v1415_v30 = vmul.f32 0.044715, %v1411_v29  ;;  %v1414_v39 = vmul.f32 0.5, %v1411_v29 }
 0x4b3   : > { %v1416_v31 = vmul.f32 %v1415_v30, %v1411_v29 }
 0x4b5   : > { %v1417_v32 = vmul.f32 %v1416_v31, %v1411_v29 }
 0x4b6   : > { %v1399_v33 = vpop.f32.mrf.mxu0  ;;  %v1412_v34 = vpop.f32.mrf.mxu1 }
 0x4b7   : > { %v1418_v35 = vadd.f32 %v1417_v32, %v1411_v29 }
 0x4b9   : > { %v1419_v36 = vmul.f32 0.7978846, %v1418_v35 }
 0x4bb   : > { %2291 = vtanh.f32 %v1419_v36 }
 0x4c1   : > { %v2292_v38 = vpop.eup %2291 }
 0x4c2   : > { %v1421_v40 = vadd.f32 1.0, %v2292_v38 }
 0x4c4   : > { %v1422_v42 = vmul.f32 %v1421_v40, %v1414_v39 }
 0x4c6   : > { %v1423_v43 = vmul.f32 %v1422_v42, %v1398_v41 }
 0x4c8   : > { %v1424_v44 = vpack.c.bf16 %v1423_v43, %v1423_v43 }
 0x4ca   : > { %1497 = vmatmul.bf16.vlgmr.msra.gmra.mxu2 %v1424_v44 }
 0x54d   : > { %v1498_v46 = vpop.f32.mrf.mxu2 }
 0x54e   : > { %v1502_v47 = vadd.f32 %v1498_v46, %v2936_v9 }
 0x550   : > { %v1507_v48 = vadd.f32 %v2276_v45, %v1502_v47 }
 0x552   : > { %1508 = vst [vmem:[%s637_s3] sm:$0xff] %v1507_v48 }
 0x553   : > { %2590 = shalt.err (!%p2587_p9)
}
 0x554   : > { %2173 = dma.vmem_to_hbm [thread:$0]  (%p2856_p4), %s1523_s9, 128, %s1525_s29, %s1510_s22  }
 0x555   : > { %v1500_v9 = vpop.f32.mrf.mxu2 }
 0x556 PF: > { %s1536_s23 = sand.u32 1, %s2633_s18   ;;  %p3038_p10 = scmp.ge.s32.totalorder %s2645_s21, 2 }
 0x557   : > { %s1537_s11 = scalar_lea.sflag [#allocation4], %s1536_s23 }
 0x558   : > { %p2205_p13 = pnand %p3038_p10, %p2860_p6 }
 0x55a   : > { %p2206_p11 = pneg %p2205_p13 }
 0x55c   : > { %2628 = dma.done.wait (%p2206_p11), %s1537_s11, 128  }
 0x55d   : > { %2630 = vsyncadd (%p2206_p11), %s1537_s11, 4294967168  ;;  %p32_p0 = scmp.ge.s32.totalorder %s2830_s5, 4   ;;  %s3039_s18 = smov %s2637_s19 }
 0x55e   : > { %s3040_s19 = smov %s2641_s20  ;;  %s3041_s20 = smov %s2841_s10 }
 0x55f   : > { %s3042_s21 = smov %s2830_s5  ;;  %34 = sbr.rel (!%p32_p0) target bundleno = 20 (0x14), region = 157 }
 0x564   :  { %1543 = vsyncpa [#allocation3], 1 }
 0x565   :  { %1545 = vsyncpa [#allocation3 + $0x1], 1 }
 0x566   :  { %1546 = vsyncpa [#allocation6], 1 }
 0x567   :  { %1547 = vsyncpa [#allocation9], 1 }
 0x568   :  { %1548 = vsyncpa [#allocation12], 1 }
 0x569   :  { %1549 = vsyncpa [#allocation15], 1 }
 0x56a   :  { %1550 = vsyncpa [#allocation4], 1 }
 0x56b   :  { %1552 = vsyncpa [#allocation4 + $0x1], 1 }

</bundles_post_ra>
